<compile_context>
chip_gen: v7x
topology: tpu7x:2x2x1
jax: 0.10.0
libtpu: 0.0.40
codegen_flags: <defaults>
</compile_context>

<pallas_src>
import functools

import jax
import jax.numpy as jnp
from jax.experimental import pallas as pl
from jax.experimental.pallas import tpu as pltpu

SLOPE = 0.1  # xtanh slope (PyTorch module default)


# ----------------------------------------------------------------------------
# layout helpers
# ----------------------------------------------------------------------------
def _round_up(n, m):
    return ((n + m - 1) // m) * m


def _padded_dims(data_dim, latent_dim, hidden_dim):
    return (_round_up(data_dim, 128),
            _round_up(latent_dim, 128),
            _round_up(hidden_dim, 128))


def _mid_layout(Dp, Lp, Hp):
    """Column offsets of the Hp-row 'mid' weight slab:
       [gw2 | lw2 | gw3 | lw3 | fw2 | fw3]."""
    widths = (Hp, Hp, Lp, Lp, Hp, Dp)
    offs, o = [], 0
    for w in widths:
        offs.append(o)
        o += w
    return tuple(offs), o


def _bias_layout(Dp, Lp, Hp):
    """Column offsets of the bias slab:
       [enc1 (2Hp) | enc2 (2Hp) | enc3 (2Lp) | dec1 (Hp) | dec2 (Hp) | dec3 (Dp)]."""
    widths = (2 * Hp, 2 * Hp, 2 * Lp, Hp, Hp, Dp)
    offs, o = [], 0
    for w in widths:
        offs.append(o)
        o += w
    return tuple(offs), o


def _pick_tile_m(M):
    """Row tile: minimize padded rows, prefer large tiles, and guarantee
    >= 2 grid steps for batches >= 16 rows (v7x megacore sharding)."""
    Mp8 = _round_up(M, 8)
    if Mp8 < 16:
        return Mp8, Mp8
    cap = min(512, _round_up(Mp8 // 2, 8))
    cands = {cap} | {t for t in (128, 256, 512) if t <= cap}
    best = min(cands, key=lambda t: (_round_up(Mp8, t), -t))
    return best, _round_up(Mp8, best)


def _vmem_budget(tile_m, Dp, Lp, Hp, c_mid, total_b, single_buffer):
    """Conservative scoped-VMEM request: resident slabs + double-buffered row
    tiles + generous room for the (tile_m, 2*Hp) intermediates."""
    wbuf = 1 if single_buffer else 2
    weights = wbuf * 2 * (Dp * 2 * Hp + Hp * c_mid + Lp * Hp)      # bf16 slabs
    biases = wbuf * 4 * 8 * total_b                                # (1,N) f32, 8-sublane padded
    io = 2 * 4 * tile_m * (Dp + Lp)                                # x, eps tiles (double-buffered)
    io += 2 * 4 * tile_m * (Dp + 3 * Lp)                           # f, g, v, s tiles
    inter = 8 * 4 * tile_m * max(2 * Hp, Dp + 3 * Lp)              # headroom for intermediates
    budget = weights + biases + io + inter + (2 << 20)
    return int(min(max(budget, 8 << 20), 56 << 20))                # 56 MiB cap (v7x = 64 MiB)


# ----------------------------------------------------------------------------
# parameter init / packing
# ----------------------------------------------------------------------------
def init_mlp_params(key, input_dim, output_dim, hidden_dim):
    """nn.Linear-style init (uniform +-1/sqrt(fan_in)); weights stored (in, out)."""
    dims = [(input_dim, hidden_dim), (hidden_dim, hidden_dim), (hidden_dim, output_dim)]
    params = []
    for (din, dout) in dims:
        key, kw, kb = jax.random.split(key, 3)
        bound = float(din) ** -0.5
        w = jax.random.uniform(kw, (din, dout), jnp.float32, -bound, bound)
        b = jax.random.uniform(kb, (dout,), jnp.float32, -bound, bound)
        params += [w, b]
    return params, key


def pack_vae_params(g_params, logv_params, f_params, data_dim, latent_dim, hidden_dim):
    """Pack all 18 params into 3 bf16 weight slabs (no dead rows) + 1 f32 bias slab."""
    Dp, Lp, Hp = _padded_dims(data_dim, latent_dim, hidden_dim)
    d, l, h = data_dim, latent_dim, hidden_dim
    gw1, gb1, gw2, gb2, gw3, gb3 = g_params
    lw1, lb1, lw2, lb2, lw3, lb3 = logv_params
    fw1, fb1, fw2, fb2, fw3, fb3 = f_params
    moffs, c_mid = _mid_layout(Dp, Lp, Hp)
    boffs, total_b = _bias_layout(Dp, Lp, Hp)

    # fused encoder layer 1: (Dp, 2Hp) = [gw1 | lw1]
    w_enc1 = jnp.zeros((Dp, 2 * Hp), jnp.float32)
    w_enc1 = w_enc1.at[:d, :h].set(gw1).at[:d, Hp:Hp + h].set(lw1)

    # dense Hp-row slab: [gw2 | lw2 | gw3 | lw3 | fw2 | fw3]
    w_mid = jnp.zeros((Hp, c_mid), jnp.float32)
    w_mid = (w_mid
             .at[:h, moffs[0]:moffs[0] + h].set(gw2)
             .at[:h, moffs[1]:moffs[1] + h].set(lw2)
             .at[:h, moffs[2]:moffs[2] + l].set(gw3)
             .at[:h, moffs[3]:moffs[3] + l].set(lw3)
             .at[:h, moffs[4]:moffs[4] + h].set(fw2)
             .at[:h, moffs[5]:moffs[5] + d].set(fw3))

    # decoder layer 1: (Lp, Hp)
    w_dec1 = jnp.zeros((Lp, Hp), jnp.float32)
    w_dec1 = w_dec1.at[:l, :h].set(fw1)

    # biases stay f32 (added after the f32-accumulated matmuls)
    b_all = jnp.zeros((1, total_b), jnp.float32)
    b_all = (b_all
             .at[0, boffs[0]:boffs[0] + h].set(gb1)
             .at[0, boffs[0] + Hp:boffs[0] + Hp + h].set(lb1)
             .at[0, boffs[1]:boffs[1] + h].set(gb2)
             .at[0, boffs[1] + Hp:boffs[1] + Hp + h].set(lb2)
             .at[0, boffs[2]:boffs[2] + l].set(gb3)
             .at[0, boffs[2] + Lp:boffs[2] + Lp + l].set(lb3)
             .at[0, boffs[3]:boffs[3] + h].set(fb1)
             .at[0, boffs[4]:boffs[4] + h].set(fb2)
             .at[0, boffs[5]:boffs[5] + d].set(fb3))

    return (w_enc1.astype(jnp.bfloat16),
            w_mid.astype(jnp.bfloat16),
            w_dec1.astype(jnp.bfloat16),
            b_all)


# ----------------------------------------------------------------------------
# kernel
# ----------------------------------------------------------------------------
def _xtanh(x):
    return jnp.tanh(x) + SLOPE * x


def _clean_vae_kernel(x_ref, eps_ref, we1_ref, wmid_ref, wd1_ref, b_ref,
                      f_ref, g_ref, v_ref, s_ref, *, dims, moffs, boffs):
    Dp, Lp, Hp = dims
    m_g2, m_l2, m_g3, m_l3, m_d2, m_d3 = moffs
    b_e1, b_e2, b_e3, b_d1, b_d2, b_d3 = boffs

    def mm(a_f32, w_bf16):
        # bf16 x bf16 on the MXU, f32 accumulation; elementwise math stays f32.
        return jnp.dot(a_f32.astype(jnp.bfloat16), w_bf16,
                       preferred_element_type=jnp.float32)

    x = x_ref[...]
    eps = eps_ref[...]

    # --- fused encoder layer 1: one (Dp, 2Hp) matmul producing [g | logv] path
    h = _xtanh(mm(x, we1_ref[...]) + b_ref[0:1, b_e1:b_e1 + 2 * Hp])

    # --- encoder layer 2: two dense (Hp, Hp) matmuls on 128-aligned LHS slices
    hg = _xtanh(mm(h[:, :Hp], wmid_ref[:, m_g2:m_g2 + Hp])
                + b_ref[0:1, b_e2:b_e2 + Hp])
    hl = _xtanh(mm(h[:, Hp:], wmid_ref[:, m_l2:m_l2 + Hp])
                + b_ref[0:1, b_e2 + Hp:b_e2 + 2 * Hp])

    # --- encoder layer 3 (no activation) -> g, logv
    g = mm(hg, wmid_ref[:, m_g3:m_g3 + Lp]) + b_ref[0:1, b_e3:b_e3 + Lp]
    logv = mm(hl, wmid_ref[:, m_l3:m_l3 + Lp]) + b_ref[0:1, b_e3 + Lp:b_e3 + 2 * Lp]

    # --- reparameterize: one exp on the EUP; the muls ride the VPU
    std = jnp.exp(0.5 * logv)
    v = std * std
    s = eps * std + g

    # --- decoder
    h = _xtanh(mm(s, wd1_ref[...]) + b_ref[0:1, b_d1:b_d1 + Hp])
    h = _xtanh(mm(h, wmid_ref[:, m_d2:m_d2 + Hp]) + b_ref[0:1, b_d2:b_d2 + Hp])
    f = mm(h, wmid_ref[:, m_d3:m_d3 + Dp]) + b_ref[0:1, b_d3:b_d3 + Dp]

    # four lane-dense (128-multiple) unmasked stores
    f_ref[...] = f
    g_ref[...] = g
    v_ref[...] = v
    s_ref[...] = s


# ----------------------------------------------------------------------------
# wrapper
# ----------------------------------------------------------------------------
@functools.partial(
    jax.jit,
    static_argnames=("data_dim", "latent_dim", "hidden_dim", "single_buffer_weights"))
def clean_vae_forward(x, eps, w_enc1, w_mid, w_dec1, b_all, *,
                      data_dim, latent_dim, hidden_dim, single_buffer_weights=True):
    M = x.shape[0]
    Dp, Lp, Hp = _padded_dims(data_dim, latent_dim, hidden_dim)
    moffs, c_mid = _mid_layout(Dp, Lp, Hp)
    boffs, total_b = _bias_layout(Dp, Lp, Hp)

    tile_m, Mp = _pick_tile_m(M)

    # two separate lane-dense, zero-padded inputs (no wrapper-side slab pack)
    xp = jnp.pad(x.astype(jnp.float32), ((0, Mp - M), (0, Dp - data_dim)))
    ep = jnp.pad(eps.astype(jnp.float32), ((0, Mp - M), (0, Lp - latent_dim)))

    # resident (never-changing) params: single-buffer when supported
    wkw = {"pipeline_mode": pl.Buffered(1)} if single_buffer_weights else {}

    kernel = functools.partial(
        _clean_vae_kernel, dims=(Dp, Lp, Hp), moffs=moffs, boffs=boffs)

    f, g, v, s = pl.pallas_call(
        kernel,
        out_shape=(
            jax.ShapeDtypeStruct((Mp, Dp), jnp.float32),   # f
            jax.ShapeDtypeStruct((Mp, Lp), jnp.float32),   # g
            jax.ShapeDtypeStruct((Mp, Lp), jnp.float32),   # v
            jax.ShapeDtypeStruct((Mp, Lp), jnp.float32),   # s
        ),
        grid=(Mp // tile_m,),
        in_specs=[
            pl.BlockSpec((tile_m, Dp), lambda i: (i, 0)),
            pl.BlockSpec((tile_m, Lp), lambda i: (i, 0)),
            pl.BlockSpec((Dp, 2 * Hp), lambda i: (0, 0), **wkw),
            pl.BlockSpec((Hp, c_mid), lambda i: (0, 0), **wkw),
            pl.BlockSpec((Lp, Hp), lambda i: (0, 0), **wkw),
            pl.BlockSpec((1, total_b), lambda i: (0, 0), **wkw),
        ],
        out_specs=(
            pl.BlockSpec((tile_m, Dp), lambda i: (i, 0)),
            pl.BlockSpec((tile_m, Lp), lambda i: (i, 0)),
            pl.BlockSpec((tile_m, Lp), lambda i: (i, 0)),
            pl.BlockSpec((tile_m, Lp), lambda i: (i, 0)),
        ),
        compiler_params=pltpu.CompilerParams(
            dimension_semantics=("parallel",),
            vmem_limit_bytes=_vmem_budget(
                tile_m, Dp, Lp, Hp, c_mid, total_b, single_buffer_weights),
        ),
    )(xp, ep, w_enc1, w_mid, w_dec1, b_all)

    return (f[:M, :data_dim],
            g[:M, :latent_dim],
            v[:M, :latent_dim],
            s[:M, :latent_dim])


# ----------------------------------------------------------------------------
# pure-JAX references (original module semantics)
# ----------------------------------------------------------------------------
def _mlp3_ref(h, params, matmul_dtype=jnp.float32):
    w1, b1, w2, b2, w3, b3 = params

    def lin(a, w, b):
        return jnp.dot(a.astype(matmul_dtype), w.astype(matmul_dtype),
                       preferred_element_type=jnp.float32) + b

    z = lin(h, w1, b1)
    h = jnp.tanh(z) + SLOPE * z
    z = lin(h, w2, b2)
    h = jnp.tanh(z) + SLOPE * z
    return lin(h, w3, b3)


if __name__ == "__main__":
    # Small shapes consistent with the module: x is (batch, data_dim).
    batch = 8
    data_dim = 16
    latent_dim = 8
    hidden_dim = 32

    key = jax.random.PRNGKey(0)
    key, kx, keps = jax.random.split(key, 3)

    x = jax.random.normal(kx, (batch, data_dim), jnp.float32)
    # eps plays the role of torch.randn_like(mu) inside reparameterize.
    eps = jax.random.normal(keps, (batch, latent_dim), jnp.float32)

    g_params, key = init_mlp_params(key, data_dim, latent_dim, hidden_dim)     # g
    logv_params, key = init_mlp_params(key, data_dim, latent_dim, hidden_dim)  # logv
    f_params, key = init_mlp_params(key, latent_dim, data_dim, hidden_dim)     # f

    slabs = pack_vae_params(
        g_params, logv_params, f_params, data_dim, latent_dim, hidden_dim)

    dims = dict(data_dim=data_dim, latent_dim=latent_dim, hidden_dim=hidden_dim)
    try:
        outs = clean_vae_forward(x, eps, *slabs, **dims, single_buffer_weights=True)
        outs = jax.block_until_ready(outs)
    except Exception:
        # Fallback for jax versions without single-buffer pipeline_mode support.
        outs = clean_vae_forward(x, eps, *slabs, **dims, single_buffer_weights=False)
        outs = jax.block_until_ready(outs)
    f, g, v, s = outs

    # Reference 1: original f32 forward pass (PyTorch semantics).
    g_r = _mlp3_ref(x, g_params)
    logv_r = _mlp3_ref(x, logv_params)
    v_r = jnp.exp(logv_r)
    s_r = eps * jnp.sqrt(v_r) + g_r
    f_r = _mlp3_ref(s_r, f_params)

    # Reference 2: same forward with bf16 matmuls / f32 accumulate (mirrors
    # the kernel's MXU numerics) — used for a tight correctness check.
    g_b = _mlp3_ref(x, g_params, jnp.bfloat16)
    logv_b = _mlp3_ref(x, logv_params, jnp.bfloat16)
    std_b = jnp.exp(0.5 * logv_b)
    v_b = std_b * std_b
    s_b = eps * std_b + g_b
    f_b = _mlp3_ref(s_b, f_params, jnp.bfloat16)

    assert f.shape == (batch, data_dim)
    assert g.shape == (batch, latent_dim)
    assert v.shape == (batch, latent_dim)
    assert s.shape == (batch, latent_dim)
    assert bool(jnp.all(v > 0))
    for got, ref_bf, ref_f32 in ((f, f_b, f_r), (g, g_b, g_r),
                                 (v, v_b, v_r), (s, s_b, s_r)):
        assert bool(jnp.all(jnp.isfinite(got)))
        # tight vs bf16-matmul reference (identical math path)
        assert bool(jnp.allclose(got, ref_bf, rtol=2e-3, atol=2e-3))
        # loose vs full-f32 reference (bf16 MXU rounding drift)
        assert bool(jnp.allclose(got, ref_f32, rtol=5e-2, atol=5e-2))

    print("KERNEL_OK")
</pallas_src>

<mosaic_0001>
module attributes {stable_mosaic.version = 11 : i64} {
  func.func @_clean_vae_kernel(%arg0: i32, %arg1: memref<8x128xf32, #tpu.memory_space<vmem>>, %arg2: memref<8x128xf32, #tpu.memory_space<vmem>>, %arg3: memref<128x256xbf16, #tpu.memory_space<vmem>>, %arg4: memref<128x768xbf16, #tpu.memory_space<vmem>>, %arg5: memref<128x128xbf16, #tpu.memory_space<vmem>>, %arg6: memref<1x1152xf32, #tpu.memory_space<vmem>>, %arg7: memref<8x128xf32, #tpu.memory_space<vmem>>, %arg8: memref<8x128xf32, #tpu.memory_space<vmem>>, %arg9: memref<8x128xf32, #tpu.memory_space<vmem>>, %arg10: memref<8x128xf32, #tpu.memory_space<vmem>>) attributes {dimension_semantics = [#tpu.dimension_semantics<parallel>], iteration_bounds = array<i64: 1>, scalar_prefetch = 0 : i64, scratch_operands = 0 : i64, tpu.core_type = #tpu.core_type<tc>, window_params = [{transform_indices = @transform_0, window_bounds = array<i64: 8, 128>}, {transform_indices = @transform_1, window_bounds = array<i64: 8, 128>}, {pipeline_mode = #tpu.pipeline_mode<synchronous>, transform_indices = @transform_2, window_bounds = array<i64: 128, 256>}, {pipeline_mode = #tpu.pipeline_mode<synchronous>, transform_indices = @transform_3, window_bounds = array<i64: 128, 768>}, {pipeline_mode = #tpu.pipeline_mode<synchronous>, transform_indices = @transform_4, window_bounds = array<i64: 128, 128>}, {pipeline_mode = #tpu.pipeline_mode<synchronous>, transform_indices = @transform_5, window_bounds = array<i64: 1, 1152>}, {transform_indices = @transform_6, window_bounds = array<i64: 8, 128>}, {transform_indices = @transform_7, window_bounds = array<i64: 8, 128>}, {transform_indices = @transform_8, window_bounds = array<i64: 8, 128>}, {transform_indices = @transform_9, window_bounds = array<i64: 8, 128>}]} {
    %c0 = arith.constant 0 : index
    %c0_0 = arith.constant 0 : index
    %0 = vector.load %arg1[%c0, %c0_0] : memref<8x128xf32, #tpu.memory_space<vmem>>, vector<8x128xf32>
    %c0_1 = arith.constant 0 : index
    %c0_2 = arith.constant 0 : index
    %1 = vector.load %arg2[%c0_1, %c0_2] : memref<8x128xf32, #tpu.memory_space<vmem>>, vector<8x128xf32>
    %c0_3 = arith.constant 0 : index
    %c0_4 = arith.constant 0 : index
    %2 = vector.load %arg3[%c0_3, %c0_4] : memref<128x256xbf16, #tpu.memory_space<vmem>>, vector<128x256xbf16>
    %3 = arith.truncf %0 : vector<8x128xf32> to vector<8x128xbf16>
    %cst = arith.constant dense<0.000000e+00> : vector<8x256xf32>
    %4 = tpu.matmul %3, %2, %cst {dimension_numbers = #tpu.dot_dimension_numbers<[1], [0], [0], [1], [0, 0, 1, 1], [], []>} : vector<8x128xbf16>, vector<128x256xbf16>, vector<8x256xf32> -> vector<8x256xf32>
    %c0_5 = arith.constant 0 : index
    %c0_6 = arith.constant 0 : index
    %5 = vector.load %arg6[%c0_5, %c0_6] : memref<1x1152xf32, #tpu.memory_space<vmem>>, vector<1x256xf32>
    %6 = vector.broadcast %5 : vector<1x256xf32> to vector<8x256xf32>
    %7 = arith.addf %4, %6 : vector<8x256xf32>
    %8 = math.tanh %7 : vector<8x256xf32>
    %cst_7 = arith.constant 1.000000e-01 : f32
    %9 = vector.broadcast %cst_7 : f32 to vector<8x256xf32>
    %10 = arith.mulf %9, %7 : vector<8x256xf32>
    %11 = arith.addf %8, %10 : vector<8x256xf32>
    %12 = vector.extract_strided_slice %11 {offsets = [0, 0], sizes = [8, 128], strides = [1, 1]} : vector<8x256xf32> to vector<8x128xf32>
    %c0_8 = arith.constant 0 : index
    %c0_9 = arith.constant 0 : index
    %13 = vector.load %arg4[%c0_8, %c0_9] : memref<128x768xbf16, #tpu.memory_space<vmem>>, vector<128x128xbf16>
    %14 = arith.truncf %12 : vector<8x128xf32> to vector<8x128xbf16>
    %cst_10 = arith.constant dense<0.000000e+00> : vector<8x128xf32>
    %15 = tpu.matmul %14, %13, %cst_10 {dimension_numbers = #tpu.dot_dimension_numbers<[1], [0], [0], [1], [0, 0, 1, 1], [], []>} : vector<8x128xbf16>, vector<128x128xbf16>, vector<8x128xf32> -> vector<8x128xf32>
    %c0_11 = arith.constant 0 : index
    %c256 = arith.constant 256 : index
    %16 = vector.load %arg6[%c0_11, %c256] : memref<1x1152xf32, #tpu.memory_space<vmem>>, vector<1x128xf32>
    %17 = vector.broadcast %16 : vector<1x128xf32> to vector<8x128xf32>
    %18 = arith.addf %15, %17 : vector<8x128xf32>
    %19 = math.tanh %18 : vector<8x128xf32>
    %cst_12 = arith.constant 1.000000e-01 : f32
    %20 = vector.broadcast %cst_12 : f32 to vector<8x128xf32>
    %21 = arith.mulf %20, %18 : vector<8x128xf32>
    %22 = arith.addf %19, %21 : vector<8x128xf32>
    %23 = vector.extract_strided_slice %11 {offsets = [0, 128], sizes = [8, 128], strides = [1, 1]} : vector<8x256xf32> to vector<8x128xf32>
    %c0_13 = arith.constant 0 : index
    %c128 = arith.constant 128 : index
    %24 = vector.load %arg4[%c0_13, %c128] : memref<128x768xbf16, #tpu.memory_space<vmem>>, vector<128x128xbf16>
    %25 = arith.truncf %23 : vector<8x128xf32> to vector<8x128xbf16>
    %cst_14 = arith.constant dense<0.000000e+00> : vector<8x128xf32>
    %26 = tpu.matmul %25, %24, %cst_14 {dimension_numbers = #tpu.dot_dimension_numbers<[1], [0], [0], [1], [0, 0, 1, 1], [], []>} : vector<8x128xbf16>, vector<128x128xbf16>, vector<8x128xf32> -> vector<8x128xf32>
    %c0_15 = arith.constant 0 : index
    %c384 = arith.constant 384 : index
    %27 = vector.load %arg6[%c0_15, %c384] : memref<1x1152xf32, #tpu.memory_space<vmem>>, vector<1x128xf32>
    %28 = vector.broadcast %27 : vector<1x128xf32> to vector<8x128xf32>
    %29 = arith.addf %26, %28 : vector<8x128xf32>
    %30 = math.tanh %29 : vector<8x128xf32>
    %cst_16 = arith.constant 1.000000e-01 : f32
    %31 = vector.broadcast %cst_16 : f32 to vector<8x128xf32>
    %32 = arith.mulf %31, %29 : vector<8x128xf32>
    %33 = arith.addf %30, %32 : vector<8x128xf32>
    %c0_17 = arith.constant 0 : index
    %c256_18 = arith.constant 256 : index
    %34 = vector.load %arg4[%c0_17, %c256_18] : memref<128x768xbf16, #tpu.memory_space<vmem>>, vector<128x128xbf16>
    %35 = arith.truncf %22 : vector<8x128xf32> to vector<8x128xbf16>
    %cst_19 = arith.constant dense<0.000000e+00> : vector<8x128xf32>
    %36 = tpu.matmul %35, %34, %cst_19 {dimension_numbers = #tpu.dot_dimension_numbers<[1], [0], [0], [1], [0, 0, 1, 1], [], []>} : vector<8x128xbf16>, vector<128x128xbf16>, vector<8x128xf32> -> vector<8x128xf32>
    %c0_20 = arith.constant 0 : index
    %c512 = arith.constant 512 : index
    %37 = vector.load %arg6[%c0_20, %c512] : memref<1x1152xf32, #tpu.memory_space<vmem>>, vector<1x128xf32>
    %38 = vector.broadcast %37 : vector<1x128xf32> to vector<8x128xf32>
    %39 = arith.addf %36, %38 : vector<8x128xf32>
    %c0_21 = arith.constant 0 : index
    %c384_22 = arith.constant 384 : index
    %40 = vector.load %arg4[%c0_21, %c384_22] : memref<128x768xbf16, #tpu.memory_space<vmem>>, vector<128x128xbf16>
    %41 = arith.truncf %33 : vector<8x128xf32> to vector<8x128xbf16>
    %cst_23 = arith.constant dense<0.000000e+00> : vector<8x128xf32>
    %42 = tpu.matmul %41, %40, %cst_23 {dimension_numbers = #tpu.dot_dimension_numbers<[1], [0], [0], [1], [0, 0, 1, 1], [], []>} : vector<8x128xbf16>, vector<128x128xbf16>, vector<8x128xf32> -> vector<8x128xf32>
    %c0_24 = arith.constant 0 : index
    %c640 = arith.constant 640 : index
    %43 = vector.load %arg6[%c0_24, %c640] : memref<1x1152xf32, #tpu.memory_space<vmem>>, vector<1x128xf32>
    %44 = vector.broadcast %43 : vector<1x128xf32> to vector<8x128xf32>
    %45 = arith.addf %42, %44 : vector<8x128xf32>
    %cst_25 = arith.constant 5.000000e-01 : f32
    %46 = vector.broadcast %cst_25 : f32 to vector<8x128xf32>
    %47 = arith.mulf %46, %45 : vector<8x128xf32>
    %48 = math.exp %47 : vector<8x128xf32>
    %49 = arith.mulf %48, %48 : vector<8x128xf32>
    %50 = arith.mulf %1, %48 : vector<8x128xf32>
    %51 = arith.addf %50, %39 : vector<8x128xf32>
    %c0_26 = arith.constant 0 : index
    %c0_27 = arith.constant 0 : index
    %52 = vector.load %arg5[%c0_26, %c0_27] : memref<128x128xbf16, #tpu.memory_space<vmem>>, vector<128x128xbf16>
    %53 = arith.truncf %51 : vector<8x128xf32> to vector<8x128xbf16>
    %cst_28 = arith.constant dense<0.000000e+00> : vector<8x128xf32>
    %54 = tpu.matmul %53, %52, %cst_28 {dimension_numbers = #tpu.dot_dimension_numbers<[1], [0], [0], [1], [0, 0, 1, 1], [], []>} : vector<8x128xbf16>, vector<128x128xbf16>, vector<8x128xf32> -> vector<8x128xf32>
    %c0_29 = arith.constant 0 : index
    %c768 = arith.constant 768 : index
    %55 = vector.load %arg6[%c0_29, %c768] : memref<1x1152xf32, #tpu.memory_space<vmem>>, vector<1x128xf32>
    %56 = vector.broadcast %55 : vector<1x128xf32> to vector<8x128xf32>
    %57 = arith.addf %54, %56 : vector<8x128xf32>
    %58 = math.tanh %57 : vector<8x128xf32>
    %cst_30 = arith.constant 1.000000e-01 : f32
    %59 = vector.broadcast %cst_30 : f32 to vector<8x128xf32>
    %60 = arith.mulf %59, %57 : vector<8x128xf32>
    %61 = arith.addf %58, %60 : vector<8x128xf32>
    %c0_31 = arith.constant 0 : index
    %c512_32 = arith.constant 512 : index
    %62 = vector.load %arg4[%c0_31, %c512_32] : memref<128x768xbf16, #tpu.memory_space<vmem>>, vector<128x128xbf16>
    %63 = arith.truncf %61 : vector<8x128xf32> to vector<8x128xbf16>
    %cst_33 = arith.constant dense<0.000000e+00> : vector<8x128xf32>
    %64 = tpu.matmul %63, %62, %cst_33 {dimension_numbers = #tpu.dot_dimension_numbers<[1], [0], [0], [1], [0, 0, 1, 1], [], []>} : vector<8x128xbf16>, vector<128x128xbf16>, vector<8x128xf32> -> vector<8x128xf32>
    %c0_34 = arith.constant 0 : index
    %c896 = arith.constant 896 : index
    %65 = vector.load %arg6[%c0_34, %c896] : memref<1x1152xf32, #tpu.memory_space<vmem>>, vector<1x128xf32>
    %66 = vector.broadcast %65 : vector<1x128xf32> to vector<8x128xf32>
    %67 = arith.addf %64, %66 : vector<8x128xf32>
    %68 = math.tanh %67 : vector<8x128xf32>
    %cst_35 = arith.constant 1.000000e-01 : f32
    %69 = vector.broadcast %cst_35 : f32 to vector<8x128xf32>
    %70 = arith.mulf %69, %67 : vector<8x128xf32>
    %71 = arith.addf %68, %70 : vector<8x128xf32>
    %c0_36 = arith.constant 0 : index
    %c640_37 = arith.constant 640 : index
    %72 = vector.load %arg4[%c0_36, %c640_37] : memref<128x768xbf16, #tpu.memory_space<vmem>>, vector<128x128xbf16>
    %73 = arith.truncf %71 : vector<8x128xf32> to vector<8x128xbf16>
    %cst_38 = arith.constant dense<0.000000e+00> : vector<8x128xf32>
    %74 = tpu.matmul %73, %72, %cst_38 {dimension_numbers = #tpu.dot_dimension_numbers<[1], [0], [0], [1], [0, 0, 1, 1], [], []>} : vector<8x128xbf16>, vector<128x128xbf16>, vector<8x128xf32> -> vector<8x128xf32>
    %c0_39 = arith.constant 0 : index
    %c1024 = arith.constant 1024 : index
    %75 = vector.load %arg6[%c0_39, %c1024] : memref<1x1152xf32, #tpu.memory_space<vmem>>, vector<1x128xf32>
    %76 = vector.broadcast %75 : vector<1x128xf32> to vector<8x128xf32>
    %77 = arith.addf %74, %76 : vector<8x128xf32>
    %c0_40 = arith.constant 0 : index
    %c0_41 = arith.constant 0 : index
    %78 = vector.load %arg7[%c0_40, %c0_41] : memref<8x128xf32, #tpu.memory_space<vmem>>, vector<8x128xf32>
    tpu.vector_store %arg7[%c0_40, %c0_41], %77 {strides = array<i32>} : memref<8x128xf32, #tpu.memory_space<vmem>>, vector<8x128xf32>,
    %c0_42 = arith.constant 0 : index
    %c0_43 = arith.constant 0 : index
    %79 = vector.load %arg8[%c0_42, %c0_43] : memref<8x128xf32, #tpu.memory_space<vmem>>, vector<8x128xf32>
    tpu.vector_store %arg8[%c0_42, %c0_43], %39 {strides = array<i32>} : memref<8x128xf32, #tpu.memory_space<vmem>>, vector<8x128xf32>,
    %c0_44 = arith.constant 0 : index
    %c0_45 = arith.constant 0 : index
    %80 = vector.load %arg9[%c0_44, %c0_45] : memref<8x128xf32, #tpu.memory_space<vmem>>, vector<8x128xf32>
    tpu.vector_store %arg9[%c0_44, %c0_45], %49 {strides = array<i32>} : memref<8x128xf32, #tpu.memory_space<vmem>>, vector<8x128xf32>,
    %c0_46 = arith.constant 0 : index
    %c0_47 = arith.constant 0 : index
    %81 = vector.load %arg10[%c0_46, %c0_47] : memref<8x128xf32, #tpu.memory_space<vmem>>, vector<8x128xf32>
    tpu.vector_store %arg10[%c0_46, %c0_47], %51 {strides = array<i32>} : memref<8x128xf32, #tpu.memory_space<vmem>>, vector<8x128xf32>,
    return
  }
  func.func @transform_0(%arg0: i32) -> (i32, i32) {
    %c0_i32 = arith.constant 0 : i32
    %c0_i32_0 = arith.constant 0 : i32
    return %arg0, %c0_i32 : i32, i32
  }
  func.func @transform_1(%arg0: i32) -> (i32, i32) {
    %c0_i32 = arith.constant 0 : i32
    %c0_i32_0 = arith.constant 0 : i32
    return %arg0, %c0_i32 : i32, i32
  }
  func.func @transform_2(%arg0: i32) -> (i32, i32) {
    %c0_i32 = arith.constant 0 : i32
    %c0_i32_0 = arith.constant 0 : i32
    %c0_i32_1 = arith.constant 0 : i32
    return %c0_i32, %c0_i32_0 : i32, i32
  }
  func.func @transform_3(%arg0: i32) -> (i32, i32) {
    %c0_i32 = arith.constant 0 : i32
    %c0_i32_0 = arith.constant 0 : i32
    %c0_i32_1 = arith.constant 0 : i32
    return %c0_i32, %c0_i32_0 : i32, i32
  }
  func.func @transform_4(%arg0: i32) -> (i32, i32) {
    %c0_i32 = arith.constant 0 : i32
    %c0_i32_0 = arith.constant 0 : i32
    %c0_i32_1 = arith.constant 0 : i32
    return %c0_i32, %c0_i32_0 : i32, i32
  }
  func.func @transform_5(%arg0: i32) -> (i32, i32) {
    %c0_i32 = arith.constant 0 : i32
    %c0_i32_0 = arith.constant 0 : i32
    %c0_i32_1 = arith.constant 0 : i32
    return %c0_i32, %c0_i32_0 : i32, i32
  }
  func.func @transform_6(%arg0: i32) -> (i32, i32) {
    %c0_i32 = arith.constant 0 : i32
    %c0_i32_0 = arith.constant 0 : i32
    return %arg0, %c0_i32 : i32, i32
  }
  func.func @transform_7(%arg0: i32) -> (i32, i32) {
    %c0_i32 = arith.constant 0 : i32
    %c0_i32_0 = arith.constant 0 : i32
    return %arg0, %c0_i32 : i32, i32
  }
  func.func @transform_8(%arg0: i32) -> (i32, i32) {
    %c0_i32 = arith.constant 0 : i32
    %c0_i32_0 = arith.constant 0 : i32
    return %arg0, %c0_i32 : i32, i32
  }
  func.func @transform_9(%arg0: i32) -> (i32, i32) {
    %c0_i32 = arith.constant 0 : i32
    %c0_i32_0 = arith.constant 0 : i32
    return %arg0, %c0_i32 : i32, i32
  }
}

module attributes {stable_mosaic.version = 11 : i64} {
  func.func @_clean_vae_kernel(%arg0: i32, %arg1: memref<8x128xf32, #tpu.memory_space<vmem>>, %arg2: memref<8x128xf32, #tpu.memory_space<vmem>>, %arg3: memref<128x256xbf16, #tpu.memory_space<vmem>>, %arg4: memref<128x768xbf16, #tpu.memory_space<vmem>>, %arg5: memref<128x128xbf16, #tpu.memory_space<vmem>>, %arg6: memref<1x1152xf32, #tpu.memory_space<vmem>>, %arg7: memref<8x128xf32, #tpu.memory_space<vmem>>, %arg8: memref<8x128xf32, #tpu.memory_space<vmem>>, %arg9: memref<8x128xf32, #tpu.memory_space<vmem>>, %arg10: memref<8x128xf32, #tpu.memory_space<vmem>>) attributes {dimension_semantics = [#tpu.dimension_semantics<parallel>], iteration_bounds = array<i64: 1>, scalar_prefetch = 0 : i64, scratch_operands = 0 : i64, tpu.core_type = #tpu.core_type<tc>, window_params = [{transform_indices = @transform_0, window_bounds = array<i64: 8, 128>}, {transform_indices = @transform_1, window_bounds = array<i64: 8, 128>}, {pipeline_mode = #tpu.pipeline_mode<synchronous>, transform_indices = @transform_2, window_bounds = array<i64: 128, 256>}, {pipeline_mode = #tpu.pipeline_mode<synchronous>, transform_indices = @transform_3, window_bounds = array<i64: 128, 768>}, {pipeline_mode = #tpu.pipeline_mode<synchronous>, transform_indices = @transform_4, window_bounds = array<i64: 128, 128>}, {pipeline_mode = #tpu.pipeline_mode<synchronous>, transform_indices = @transform_5, window_bounds = array<i64: 1, 1152>}, {transform_indices = @transform_6, window_bounds = array<i64: 8, 128>}, {transform_indices = @transform_7, window_bounds = array<i64: 8, 128>}, {transform_indices = @transform_8, window_bounds = array<i64: 8, 128>}, {transform_indices = @transform_9, window_bounds = array<i64: 8, 128>}]} {
    %c0 = arith.constant 0 : index
    %c0_0 = arith.constant 0 : index
    %0 = vector.load %arg1[%c0, %c0_0] : memref<8x128xf32, #tpu.memory_space<vmem>>, vector<8x128xf32>
    %c0_1 = arith.constant 0 : index
    %c0_2 = arith.constant 0 : index
    %1 = vector.load %arg2[%c0_1, %c0_2] : memref<8x128xf32, #tpu.memory_space<vmem>>, vector<8x128xf32>
    %c0_3 = arith.constant 0 : index
    %c0_4 = arith.constant 0 : index
    %2 = vector.load %arg3[%c0_3, %c0_4] : memref<128x256xbf16, #tpu.memory_space<vmem>>, vector<128x256xbf16>
    %3 = arith.truncf %0 : vector<8x128xf32> to vector<8x128xbf16>
    %cst = arith.constant dense<0.000000e+00> : vector<8x256xf32>
    %4 = tpu.matmul %3, %2, %cst {dimension_numbers = #tpu.dot_dimension_numbers<[1], [0], [0], [1], [0, 0, 1, 1], [], []>} : vector<8x128xbf16>, vector<128x256xbf16>, vector<8x256xf32> -> vector<8x256xf32>
    %c0_5 = arith.constant 0 : index
    %c0_6 = arith.constant 0 : index
    %5 = vector.load %arg6[%c0_5, %c0_6] : memref<1x1152xf32, #tpu.memory_space<vmem>>, vector<1x256xf32>
    %6 = vector.broadcast %5 : vector<1x256xf32> to vector<8x256xf32>
    %7 = arith.addf %4, %6 : vector<8x256xf32>
    %8 = math.tanh %7 : vector<8x256xf32>
    %cst_7 = arith.constant 1.000000e-01 : f32
    %9 = vector.broadcast %cst_7 : f32 to vector<8x256xf32>
    %10 = arith.mulf %9, %7 : vector<8x256xf32>
    %11 = arith.addf %8, %10 : vector<8x256xf32>
    %12 = vector.extract_strided_slice %11 {offsets = [0, 0], sizes = [8, 128], strides = [1, 1]} : vector<8x256xf32> to vector<8x128xf32>
    %c0_8 = arith.constant 0 : index
    %c0_9 = arith.constant 0 : index
    %13 = vector.load %arg4[%c0_8, %c0_9] : memref<128x768xbf16, #tpu.memory_space<vmem>>, vector<128x128xbf16>
    %14 = arith.truncf %12 : vector<8x128xf32> to vector<8x128xbf16>
    %cst_10 = arith.constant dense<0.000000e+00> : vector<8x128xf32>
    %15 = tpu.matmul %14, %13, %cst_10 {dimension_numbers = #tpu.dot_dimension_numbers<[1], [0], [0], [1], [0, 0, 1, 1], [], []>} : vector<8x128xbf16>, vector<128x128xbf16>, vector<8x128xf32> -> vector<8x128xf32>
    %c0_11 = arith.constant 0 : index
    %c256 = arith.constant 256 : index
    %16 = vector.load %arg6[%c0_11, %c256] : memref<1x1152xf32, #tpu.memory_space<vmem>>, vector<1x128xf32>
    %17 = vector.broadcast %16 : vector<1x128xf32> to vector<8x128xf32>
    %18 = arith.addf %15, %17 : vector<8x128xf32>
    %19 = math.tanh %18 : vector<8x128xf32>
    %cst_12 = arith.constant 1.000000e-01 : f32
    %20 = vector.broadcast %cst_12 : f32 to vector<8x128xf32>
    %21 = arith.mulf %20, %18 : vector<8x128xf32>
    %22 = arith.addf %19, %21 : vector<8x128xf32>
    %23 = vector.extract_strided_slice %11 {offsets = [0, 128], sizes = [8, 128], strides = [1, 1]} : vector<8x256xf32> to vector<8x128xf32>
    %c0_13 = arith.constant 0 : index
    %c128 = arith.constant 128 : index
    %24 = vector.load %arg4[%c0_13, %c128] : memref<128x768xbf16, #tpu.memory_space<vmem>>, vector<128x128xbf16>
    %25 = arith.truncf %23 : vector<8x128xf32> to vector<8x128xbf16>
    %cst_14 = arith.constant dense<0.000000e+00> : vector<8x128xf32>
    %26 = tpu.matmul %25, %24, %cst_14 {dimension_numbers = #tpu.dot_dimension_numbers<[1], [0], [0], [1], [0, 0, 1, 1], [], []>} : vector<8x128xbf16>, vector<128x128xbf16>, vector<8x128xf32> -> vector<8x128xf32>
    %c0_15 = arith.constant 0 : index
    %c384 = arith.constant 384 : index
    %27 = vector.load %arg6[%c0_15, %c384] : memref<1x1152xf32, #tpu.memory_space<vmem>>, vector<1x128xf32>
    %28 = vector.broadcast %27 : vector<1x128xf32> to vector<8x128xf32>
    %29 = arith.addf %26, %28 : vector<8x128xf32>
    %30 = math.tanh %29 : vector<8x128xf32>
    %cst_16 = arith.constant 1.000000e-01 : f32
    %31 = vector.broadcast %cst_16 : f32 to vector<8x128xf32>
    %32 = arith.mulf %31, %29 : vector<8x128xf32>
    %33 = arith.addf %30, %32 : vector<8x128xf32>
    %c0_17 = arith.constant 0 : index
    %c256_18 = arith.constant 256 : index
    %34 = vector.load %arg4[%c0_17, %c256_18] : memref<128x768xbf16, #tpu.memory_space<vmem>>, vector<128x128xbf16>
    %35 = arith.truncf %22 : vector<8x128xf32> to vector<8x128xbf16>
    %cst_19 = arith.constant dense<0.000000e+00> : vector<8x128xf32>
    %36 = tpu.matmul %35, %34, %cst_19 {dimension_numbers = #tpu.dot_dimension_numbers<[1], [0], [0], [1], [0, 0, 1, 1], [], []>} : vector<8x128xbf16>, vector<128x128xbf16>, vector<8x128xf32> -> vector<8x128xf32>
    %c0_20 = arith.constant 0 : index
    %c512 = arith.constant 512 : index
    %37 = vector.load %arg6[%c0_20, %c512] : memref<1x1152xf32, #tpu.memory_space<vmem>>, vector<1x128xf32>
    %38 = vector.broadcast %37 : vector<1x128xf32> to vector<8x128xf32>
    %39 = arith.addf %36, %38 : vector<8x128xf32>
    %c0_21 = arith.constant 0 : index
    %c384_22 = arith.constant 384 : index
    %40 = vector.load %arg4[%c0_21, %c384_22] : memref<128x768xbf16, #tpu.memory_space<vmem>>, vector<128x128xbf16>
    %41 = arith.truncf %33 : vector<8x128xf32> to vector<8x128xbf16>
    %cst_23 = arith.constant dense<0.000000e+00> : vector<8x128xf32>
    %42 = tpu.matmul %41, %40, %cst_23 {dimension_numbers = #tpu.dot_dimension_numbers<[1], [0], [0], [1], [0, 0, 1, 1], [], []>} : vector<8x128xbf16>, vector<128x128xbf16>, vector<8x128xf32> -> vector<8x128xf32>
    %c0_24 = arith.constant 0 : index
    %c640 = arith.constant 640 : index
    %43 = vector.load %arg6[%c0_24, %c640] : memref<1x1152xf32, #tpu.memory_space<vmem>>, vector<1x128xf32>
    %44 = vector.broadcast %43 : vector<1x128xf32> to vector<8x128xf32>
    %45 = arith.addf %42, %44 : vector<8x128xf32>
    %cst_25 = arith.constant 5.000000e-01 : f32
    %46 = vector.broadcast %cst_25 : f32 to vector<8x128xf32>
    %47 = arith.mulf %46, %45 : vector<8x128xf32>
    %48 = math.exp %47 : vector<8x128xf32>
    %49 = arith.mulf %48, %48 : vector<8x128xf32>
    %50 = arith.mulf %1, %48 : vector<8x128xf32>
    %51 = arith.addf %50, %39 : vector<8x128xf32>
    %c0_26 = arith.constant 0 : index
    %c0_27 = arith.constant 0 : index
    %52 = vector.load %arg5[%c0_26, %c0_27] : memref<128x128xbf16, #tpu.memory_space<vmem>>, vector<128x128xbf16>
    %53 = arith.truncf %51 : vector<8x128xf32> to vector<8x128xbf16>
    %cst_28 = arith.constant dense<0.000000e+00> : vector<8x128xf32>
    %54 = tpu.matmul %53, %52, %cst_28 {dimension_numbers = #tpu.dot_dimension_numbers<[1], [0], [0], [1], [0, 0, 1, 1], [], []>} : vector<8x128xbf16>, vector<128x128xbf16>, vector<8x128xf32> -> vector<8x128xf32>
    %c0_29 = arith.constant 0 : index
    %c768 = arith.constant 768 : index
    %55 = vector.load %arg6[%c0_29, %c768] : memref<1x1152xf32, #tpu.memory_space<vmem>>, vector<1x128xf32>
    %56 = vector.broadcast %55 : vector<1x128xf32> to vector<8x128xf32>
    %57 = arith.addf %54, %56 : vector<8x128xf32>
    %58 = math.tanh %57 : vector<8x128xf32>
    %cst_30 = arith.constant 1.000000e-01 : f32
    %59 = vector.broadcast %cst_30 : f32 to vector<8x128xf32>
    %60 = arith.mulf %59, %57 : vector<8x128xf32>
    %61 = arith.addf %58, %60 : vector<8x128xf32>
    %c0_31 = arith.constant 0 : index
    %c512_32 = arith.constant 512 : index
    %62 = vector.load %arg4[%c0_31, %c512_32] : memref<128x768xbf16, #tpu.memory_space<vmem>>, vector<128x128xbf16>
    %63 = arith.truncf %61 : vector<8x128xf32> to vector<8x128xbf16>
    %cst_33 = arith.constant dense<0.000000e+00> : vector<8x128xf32>
    %64 = tpu.matmul %63, %62, %cst_33 {dimension_numbers = #tpu.dot_dimension_numbers<[1], [0], [0], [1], [0, 0, 1, 1], [], []>} : vector<8x128xbf16>, vector<128x128xbf16>, vector<8x128xf32> -> vector<8x128xf32>
    %c0_34 = arith.constant 0 : index
    %c896 = arith.constant 896 : index
    %65 = vector.load %arg6[%c0_34, %c896] : memref<1x1152xf32, #tpu.memory_space<vmem>>, vector<1x128xf32>
    %66 = vector.broadcast %65 : vector<1x128xf32> to vector<8x128xf32>
    %67 = arith.addf %64, %66 : vector<8x128xf32>
    %68 = math.tanh %67 : vector<8x128xf32>
    %cst_35 = arith.constant 1.000000e-01 : f32
    %69 = vector.broadcast %cst_35 : f32 to vector<8x128xf32>
    %70 = arith.mulf %69, %67 : vector<8x128xf32>
    %71 = arith.addf %68, %70 : vector<8x128xf32>
    %c0_36 = arith.constant 0 : index
    %c640_37 = arith.constant 640 : index
    %72 = vector.load %arg4[%c0_36, %c640_37] : memref<128x768xbf16, #tpu.memory_space<vmem>>, vector<128x128xbf16>
    %73 = arith.truncf %71 : vector<8x128xf32> to vector<8x128xbf16>
    %cst_38 = arith.constant dense<0.000000e+00> : vector<8x128xf32>
    %74 = tpu.matmul %73, %72, %cst_38 {dimension_numbers = #tpu.dot_dimension_numbers<[1], [0], [0], [1], [0, 0, 1, 1], [], []>} : vector<8x128xbf16>, vector<128x128xbf16>, vector<8x128xf32> -> vector<8x128xf32>
    %c0_39 = arith.constant 0 : index
    %c1024 = arith.constant 1024 : index
    %75 = vector.load %arg6[%c0_39, %c1024] : memref<1x1152xf32, #tpu.memory_space<vmem>>, vector<1x128xf32>
    %76 = vector.broadcast %75 : vector<1x128xf32> to vector<8x128xf32>
    %77 = arith.addf %74, %76 : vector<8x128xf32>
    %c0_40 = arith.constant 0 : index
    %c0_41 = arith.constant 0 : index
    %78 = vector.load %arg7[%c0_40, %c0_41] : memref<8x128xf32, #tpu.memory_space<vmem>>, vector<8x128xf32>
    tpu.vector_store %arg7[%c0_40, %c0_41], %77 {strides = array<i32>} : memref<8x128xf32, #tpu.memory_space<vmem>>, vector<8x128xf32>,
    %c0_42 = arith.constant 0 : index
    %c0_43 = arith.constant 0 : index
    %79 = vector.load %arg8[%c0_42, %c0_43] : memref<8x128xf32, #tpu.memory_space<vmem>>, vector<8x128xf32>
    tpu.vector_store %arg8[%c0_42, %c0_43], %39 {strides = array<i32>} : memref<8x128xf32, #tpu.memory_space<vmem>>, vector<8x128xf32>,
    %c0_44 = arith.constant 0 : index
    %c0_45 = arith.constant 0 : index
    %80 = vector.load %arg9[%c0_44, %c0_45] : memref<8x128xf32, #tpu.memory_space<vmem>>, vector<8x128xf32>
    tpu.vector_store %arg9[%c0_44, %c0_45], %49 {strides = array<i32>} : memref<8x128xf32, #tpu.memory_space<vmem>>, vector<8x128xf32>,
    %c0_46 = arith.constant 0 : index
    %c0_47 = arith.constant 0 : index
    %81 = vector.load %arg10[%c0_46, %c0_47] : memref<8x128xf32, #tpu.memory_space<vmem>>, vector<8x128xf32>
    tpu.vector_store %arg10[%c0_46, %c0_47], %51 {strides = array<i32>} : memref<8x128xf32, #tpu.memory_space<vmem>>, vector<8x128xf32>,
    return
  }
  func.func @transform_0(%arg0: i32) -> (i32, i32) {
    %c0_i32 = arith.constant 0 : i32
    %c0_i32_0 = arith.constant 0 : i32
    return %arg0, %c0_i32 : i32, i32
  }
  func.func @transform_1(%arg0: i32) -> (i32, i32) {
    %c0_i32 = arith.constant 0 : i32
    %c0_i32_0 = arith.constant 0 : i32
    return %arg0, %c0_i32 : i32, i32
  }
  func.func @transform_2(%arg0: i32) -> (i32, i32) {
    %c0_i32 = arith.constant 0 : i32
    %c0_i32_0 = arith.constant 0 : i32
    %c0_i32_1 = arith.constant 0 : i32
    return %c0_i32, %c0_i32_0 : i32, i32
  }
  func.func @transform_3(%arg0: i32) -> (i32, i32) {
    %c0_i32 = arith.constant 0 : i32
    %c0_i32_0 = arith.constant 0 : i32
    %c0_i32_1 = arith.constant 0 : i32
    return %c0_i32, %c0_i32_0 : i32, i32
  }
  func.func @transform_4(%arg0: i32) -> (i32, i32) {
    %c0_i32 = arith.constant 0 : i32
    %c0_i32_0 = arith.constant 0 : i32
    %c0_i32_1 = arith.constant 0 : i32
    return %c0_i32, %c0_i32_0 : i32, i32
  }
  func.func @transform_5(%arg0: i32) -> (i32, i32) {
    %c0_i32 = arith.constant 0 : i32
    %c0_i32_0 = arith.constant 0 : i32
    %c0_i32_1 = arith.constant 0 : i32
    return %c0_i32, %c0_i32_0 : i32, i32
  }
  func.func @transform_6(%arg0: i32) -> (i32, i32) {
    %c0_i32 = arith.constant 0 : i32
    %c0_i32_0 = arith.constant 0 : i32
    return %arg0, %c0_i32 : i32, i32
  }
  func.func @transform_7(%arg0: i32) -> (i32, i32) {
    %c0_i32 = arith.constant 0 : i32
    %c0_i32_0 = arith.constant 0 : i32
    return %arg0, %c0_i32 : i32, i32
  }
  func.func @transform_8(%arg0: i32) -> (i32, i32) {
    %c0_i32 = arith.constant 0 : i32
    %c0_i32_0 = arith.constant 0 : i32
    return %arg0, %c0_i32 : i32, i32
  }
  func.func @transform_9(%arg0: i32) -> (i32, i32) {
    %c0_i32 = arith.constant 0 : i32
    %c0_i32_0 = arith.constant 0 : i32
    return %arg0, %c0_i32 : i32, i32
  }
}

</mosaic_0001>

<bundles_post_ra>
// kernel: clean_vae_forward.1
= control target key start
LH: loop header
LB: loop body
LE: loop exit
PB: predicated region body
PF: predicated region fallthrough
CT: control target
= control target key end

     0   :  { %15 = vsyncpa [#allocation3], 0  ;;  %s1899_s0 = inlined_call_operand.vmem [shape: f32[8,128], index: 0, kind: input, shape index: {}]   ;;  %s1900_s1 = inlined_call_operand.vmem [shape: f32[8,128], index: 1, kind: input, shape index: {}]   ;;  %s1901_s2 = inlined_call_operand.hbm [shape: bf16[128,256], index: 2, kind: input, shape index: {}]   ;;  %s1902_s3 = inlined_call_operand.hbm [shape: bf16[128,768], index: 3, kind: input, shape index: {}]   ;;  %s1903_s4 = inlined_call_operand.hbm [shape: bf16[128,128], index: 4, kind: input, shape index: {}]   ;;  %s1904_s5 = inlined_call_operand.vmem [shape: f32[1,1152], index: 5, kind: input, shape index: {}]   ;;  %s1905_s6 = inlined_call_operand.hbm [shape: f32[8,128], index: 6, kind: output, shape index: {0}]   ;;  %s1906_s7 = inlined_call_operand.hbm [shape: f32[8,128], index: 7, kind: output, shape index: {1}]   ;;  %s1907_s8 = inlined_call_operand.hbm [shape: f32[8,128], index: 8, kind: output, shape index: {2}]   ;;  %s1908_s9 = inlined_call_operand.hbm [shape: f32[8,128], index: 9, kind: output, shape index: {3}]  }
   0x1   :  { %16 = vsyncpa [#allocation6], 0 }
   0x2   :  { %17 = vsyncpa [#allocation4], 0 }
   0x3   :  { %18 = vsyncpa [#allocation10], 0 }
   0x4   :  { %19 = vsyncpa [#allocation13], 0  ;;  %s1649_s30 = smov [#allocation5]   ;;  %s1485_s13 = scalar_lea.hbm %s1902_s3, 6144 }
   0x5   :  { %s41_s10 = sshll.u32 %s1649_s30, 4  ;;  %p1486_p0 = scmp.ne.s32.totalorder %s1902_s3, %s1485_s13  ;;  %s42_s10 = int_to_ptr.vmem [resolvable:$true] %s41_s10 }
   0x6   :  { %p1489_p1 = scmp.lt.u32.totalorder %s1485_s13, %s1902_s3 }
   0x8   :  { %p1491_p2 = pnand %p1489_p1, %p1486_p0 }
   0xa   :  { %1494 = shalt.err (!%p1491_p2)
}
   0xb   :  { %s1495_s18 = scalar_lea.vmem %s42_s10, 6144  ;;  %p1500_p4 = scmp.lt.s32.totalorder %s42_s10, %s42_s10 }
   0xc   :  { %p1496_p3 = scmp.ne.s32.totalorder %s42_s10, %s1495_s18  ;;  %p1501_p5 = scmp.lt.s32.totalorder %s1495_s18, %s1495_s18 }
   0xe   :  { %p1502_p6 = por %p1501_p5, %p1500_p4 }
  0x10   :  { %p1503_p7 = pnand %p1502_p6, %p1496_p3 }
  0x12   :  { %1506 = shalt.err (!%p1503_p7)
}
  0x13   :  { %s1650_s19 = smov 384   ;;  %s1651_s20 = smov 24  }
  0x14   :  { %47 = dma.hbm_to_vmem [thread:$0]  %s1902_s3, 6144, %s42_s10, [#allocation6], %s1650_s19, %s1650_s19, %s1651_s20  }
  0x15   :  { %s1652_s23 = smov [#allocation2]   ;;  %s1507_s27 = scalar_lea.hbm %s1901_s2, 2048 }
  0x16   :  { %s29_s24 = sshll.u32 %s1652_s23, 4  ;;  %p1508_p8 = scmp.ne.s32.totalorder %s1901_s2, %s1507_s27  ;;  %s30_s24 = int_to_ptr.vmem [resolvable:$true] %s29_s24 }
  0x17   :  { %p1511_p9 = scmp.lt.u32.totalorder %s1507_s27, %s1901_s2 }
  0x19   :  { %p1513_p10 = pnand %p1511_p9, %p1508_p8 }
  0x1b   :  { %1516 = shalt.err (!%p1513_p10)
}
  0x1c   :  { %s1517_s12 = scalar_lea.vmem %s30_s24, 2048  ;;  %p1522_p12 = scmp.lt.s32.totalorder %s30_s24, %s30_s24 }
  0x1d   :  { %p1518_p11 = scmp.ne.s32.totalorder %s30_s24, %s1517_s12  ;;  %p1523_p13 = scmp.lt.s32.totalorder %s1517_s12, %s1517_s12 }
  0x1f   :  { %p1524_p0 = por %p1523_p13, %p1522_p12 }
  0x21   :  { %p1525_p1 = pnand %p1524_p0, %p1518_p11 }
  0x23   :  { %1528 = shalt.err (!%p1525_p1)
}
  0x24   :  { %s1653_s3 = smov 128   ;;  %s1654_s10 = smov 8  }
  0x25   :  { %35 = dma.hbm_to_vmem [thread:$0]  %s1901_s2, 2048, %s30_s24, [#allocation3], %s1653_s3, %s1653_s3, %s1654_s10  }
  0x26   :  { %s1655_s15 = smov [#allocation7]   ;;  %s1529_s19 = scalar_lea.hbm %s1903_s4, 1024 }
  0x27   :  { %s53_s16 = sshll.u32 %s1655_s15, 4  ;;  %p1530_p2 = scmp.ne.s32.totalorder %s1903_s4, %s1529_s19  ;;  %s54_s16 = int_to_ptr.vmem [resolvable:$true] %s53_s16 }
  0x28   :  { %p1533_p3 = scmp.lt.u32.totalorder %s1529_s19, %s1903_s4 }
  0x2a   :  { %p1535_p4 = pnand %p1533_p3, %p1530_p2 }
  0x2c   :  { %1538 = shalt.err (!%p1535_p4)
}
  0x2d   :  { %s1539_s25 = scalar_lea.vmem %s54_s16, 1024  ;;  %p1544_p6 = scmp.lt.s32.totalorder %s54_s16, %s54_s16 }
  0x2e   :  { %p1540_p5 = scmp.ne.s32.totalorder %s54_s16, %s1539_s25  ;;  %p1545_p7 = scmp.lt.s32.totalorder %s1539_s25, %s1539_s25 }
  0x30   :  { %p1546_p8 = por %p1545_p7, %p1544_p6 }
  0x32   :  { %p1547_p9 = pnand %p1546_p8, %p1540_p5 }
  0x34   :  { %1550 = shalt.err (!%p1547_p9)
}
  0x35   :  { %s1656_s2 = smov 64   ;;  %s1657_s24 = smov 4  }
  0x36   :  { %59 = dma.hbm_to_vmem [thread:$0]  %s1903_s4, 1024, %s54_s16, [#allocation6], %s1656_s2, %s1656_s2, %s1657_s24  }
  0x37   :  { %1639 = dma.done.wait [#allocation3], 2048  }
  0x38   :  { %1640 = vsyncadd [#allocation3], 4294965248 }
  0x39   :  { %1641 = dma.done.wait [#allocation6], 7168  }
  0x3a   :  { %1642 = vsyncadd [#allocation6], 4294960128  ;;  %v1658_v0 = vmov 0   ;;  %v1659_v1 = vmov 0.0   ;;  %v1391_v2 = vld [vmem:[#allocation2 + $0x4] ss:$8 sps:$4 sm:$0xff]   ;;  %v93_v36 = vlaneseq }
  0x3b   :  { %215 = vmatprep.mubr.bf16.mxu0 %v1658_v0  ;;  %1235 = vmatprep.subr.bf16.mxu1 %v1659_v1  ;;  %v1393_v3 = vld [vmem:[#allocation2] ss:$8 sps:$4 sm:$0xff]   ;;  %v1394_v4 = vld [vmem:[#allocation2 + $0x14] ss:$8 sps:$4 sm:$0xff]   ;;  %v1396_v5 = vld [vmem:[#allocation2 + $0x10] ss:$8 sps:$4 sm:$0xff]  }
  0x3c   :  { %183 = vmatprep.subr.bf16.mxu0 %v1391_v2  ;;  %v1397_v6 = vld [vmem:[#allocation2 + $0x24] ss:$8 sps:$4 sm:$0xff]   ;;  %v1399_v7 = vld [vmem:[#allocation2 + $0x20] ss:$8 sps:$4 sm:$0xff]   ;;  %v1400_v8 = vld [vmem:[#allocation2 + $0x34] ss:$8 sps:$4 sm:$0xff]  }
  0x3d   :  { %184 = vmatpush1.bf16.msra.mxu0 %v1393_v3  ;;  %v1402_v9 = vld [vmem:[#allocation2 + $0x30] ss:$8 sps:$4 sm:$0xff]   ;;  %v1403_v11 = vld [vmem:[#allocation2 + $0x44] ss:$8 sps:$4 sm:$0xff]   ;;  %v1405_v13 = vld [vmem:[#allocation2 + $0x40] ss:$8 sps:$4 sm:$0xff]  }
  0x3e   :  { %185 = vmatprep.subr.bf16.mxu0 %v1394_v4  ;;  %v1415_v10 = vld [vmem:[#allocation5] ss:$24 sps:$4 sm:$0xff]   ;;  %v1417_v12 = vld [vmem:[#allocation5 + $0x30] ss:$24 sps:$4 sm:$0xff]   ;;  %v1406_v14 = vld [vmem:[#allocation2 + $0x54] ss:$8 sps:$4 sm:$0xff]  }
  0x3f   :  { %1236 = vmatpush3.bf16.msra.mxu1 %v1415_v10  ;;  %v1408_v15 = vld [vmem:[#allocation2 + $0x50] ss:$8 sps:$4 sm:$0xff]   ;;  %v1409_v17 = vld [vmem:[#allocation2 + $0x64] ss:$8 sps:$4 sm:$0xff]   ;;  %v1411_v19 = vld [vmem:[#allocation2 + $0x60] ss:$8 sps:$4 sm:$0xff]  }
  0x40   :  { %1237 = vmatprep.subr.bf16.mxu1 %v1659_v1  ;;  %v1419_v16 = vld [vmem:[#allocation5 + $0x60] ss:$24 sps:$4 sm:$0xff]   ;;  %v1421_v18 = vld [vmem:[#allocation5 + $0x90] ss:$24 sps:$4 sm:$0xff]   ;;  %v1412_v20 = vld [vmem:[#allocation2 + $0x74] ss:$8 sps:$4 sm:$0xff]  }
  0x41   :  { %186 = vmatpush1.bf16.msra.mxu0 %v1396_v5  ;;  %v1414_v21 = vld [vmem:[#allocation2 + $0x70] ss:$8 sps:$4 sm:$0xff]   ;;  %v72_v22 = vld [vmem:[%s1899_s0] sm:$0xff]  ;;  %v1418_v25 = vld [vmem:[#allocation5 + $0x34] ss:$24 sps:$4 sm:$0xff]   ;;  %vm1660_vm0 = vmmov 0  }
  0x42   :  { %187 = vmatprep.subr.bf16.mxu0 %v1397_v6  ;;  %v1416_v23 = vld [vmem:[#allocation5 + $0x4] ss:$24 sps:$4 sm:$0xff]   ;;  %v90_v24 = vpack.c.bf16 %v72_v22, %v72_v22  ;;  %v1422_v27 = vld [vmem:[#allocation5 + $0x94] ss:$24 sps:$4 sm:$0xff]   ;;  %v1423_v28 = vld [vmem:[#allocation5 + $0xc0] ss:$24 sps:$4 sm:$0xff]   ;;  %1251 = vmatprep.mubr.msk.bf16.mxu1 %vm1660_vm0, %v1659_v1 }
  0x43   :  { %1238 = vmatpush3.bf16.msra.mxu1 %v1417_v12  ;;  %v1420_v26 = vld [vmem:[#allocation5 + $0x64] ss:$24 sps:$4 sm:$0xff]   ;;  %v1425_v30 = vld [vmem:[#allocation5 + $0xf0] ss:$24 sps:$4 sm:$0xff]   ;;  %v1426_v31 = vld [vmem:[#allocation5 + $0xf4] ss:$24 sps:$4 sm:$0xff]  }
  0x44   :  { %1239 = vmatprep.subr.bf16.mxu1 %v1659_v1  ;;  %v1424_v29 = vld [vmem:[#allocation5 + $0xc4] ss:$24 sps:$4 sm:$0xff]   ;;  %v1427_v32 = vld [vmem:[#allocation5 + $0x120] ss:$24 sps:$4 sm:$0xff]   ;;  %v1429_v34 = vld [vmem:[#allocation5 + $0x150] ss:$24 sps:$4 sm:$0xff]  }
  0x45   :  { %188 = vmatpush1.bf16.msra.mxu0 %v1399_v7  ;;  %v1428_v33 = vld [vmem:[#allocation5 + $0x124] ss:$24 sps:$4 sm:$0xff]   ;;  %v1430_v35 = vld [vmem:[#allocation5 + $0x154] ss:$24 sps:$4 sm:$0xff]   ;;  %v94_v37 = vshrl.u32 %v93_v36, 7  ;;  %s1661_s21 = smov [#allocation9]  }
  0x46   :  { %189 = vmatprep.subr.bf16.mxu0 %v1400_v8  ;;  %v91_v39 = vld [vmem:[%s1904_s5] sm:$0x3]  ;;  %v1432_v57 = vld [vmem:[#allocation5 + $0xc] ss:$24 sps:$4 sm:$0xff]   ;;  %v1433_v59 = vld [vmem:[#allocation5 + $0x38] ss:$24 sps:$4 sm:$0xff]  }
  0x47   :  { %1240 = vmatpush3.bf16.msra.mxu1 %v1419_v16  ;;  %v95_v38 = vsub.s32 0, %v94_v37  ;;  %v99_v40 = vsub.s32 1, %v94_v37  ;;  %v1431_v55 = vld [vmem:[#allocation5 + $0x8] ss:$24 sps:$4 sm:$0xff]   ;;  %v1434_v60 = vld [vmem:[#allocation5 + $0x3c] ss:$24 sps:$4 sm:$0xff]  }
  0x48   :  { %1241 = vmatprep.subr.bf16.mxu1 %v1659_v1  ;;  %v1435_v61 = vld [vmem:[#allocation5 + $0x68] ss:$24 sps:$4 sm:$0xff]   ;;  %v1436_v62 = vld [vmem:[#allocation5 + $0x6c] ss:$24 sps:$4 sm:$0xff]   ;;  %v1437_v63 = vld [vmem:[#allocation5 + $0x98] ss:$24 sps:$4 sm:$0xff]  }
  0x49   :  { %190 = vmatpush1.bf16.msra.mxu0 %v1402_v9  ;;  %v96_v41 = vrot.slane %v91_v39, %v95_v38  ;;  %v100_v42 = vrot.slane %v91_v39, %v99_v40  ;;  %v1438_v0 = vld [vmem:[#allocation5 + $0x9c] ss:$24 sps:$4 sm:$0xff]   ;;  %v1439_v2 = vld [vmem:[#allocation5 + $0xc8] ss:$24 sps:$4 sm:$0xff]   ;;  %v1440_v3 = vld [vmem:[#allocation5 + $0xcc] ss:$24 sps:$4 sm:$0xff]  }
  0x4a   :  { %191 = vmatprep.subr.bf16.mxu0 %v1403_v11  ;;  %v1441_v4 = vld [vmem:[#allocation5 + $0xf8] ss:$24 sps:$4 sm:$0xff]   ;;  %v1442_v5 = vld [vmem:[#allocation5 + $0xfc] ss:$24 sps:$4 sm:$0xff]   ;;  %v1443_v6 = vld [vmem:[#allocation5 + $0x128] ss:$24 sps:$4 sm:$0xff]  }
  0x4b   :  { %1242 = vmatpush3.bf16.msra.mxu1 %v1421_v18  ;;  %v1444_v7 = vld [vmem:[#allocation5 + $0x12c] ss:$24 sps:$4 sm:$0xff]   ;;  %v1445_v8 = vld [vmem:[#allocation5 + $0x158] ss:$24 sps:$4 sm:$0xff]   ;;  %v1446_v9 = vld [vmem:[#allocation5 + $0x15c] ss:$24 sps:$4 sm:$0xff]  }
  0x4c   :  { %1243 = vmatprep.subr.bf16.mxu1 %v1659_v1  ;;  %v1109_v10 = vld [vmem:[%s1904_s5 + $0x2] ss:$0 sm:$0xff]  ;;  %v1118_v11 = vld [vmem:[%s1904_s5 + $0x3] ss:$0 sm:$0xff]  ;;  %v1453_v36 = vld [vmem:[#allocation7 + $0x30] sm:$0xff]   ;;  %s1052_s22 = sshll.u32 %s1661_s21, 4  ;;  %s1053_s22 = int_to_ptr.vmem [resolvable:$true] %s1052_s22 }
  0x4d   :  { %192 = vmatpush1.bf16.msra.mxu0 %v1405_v13  ;;  %v1454_v37 = vld [vmem:[#allocation7 + $0x38] sm:$0xff]   ;;  %v1455_v38 = vld [vmem:[#allocation5 + $0x10] ss:$24 sps:$4 sm:$0xff]   ;;  %s1551_s23 = scalar_lea.vmem %s1053_s22, 128  ;;  %p1556_p11 = scmp.lt.s32.totalorder %s1053_s22, %s1053_s22 }
  0x4e   :  { %193 = vmatprep.subr.bf16.mxu0 %v1406_v14  ;;  %v1456_v39 = vld [vmem:[#allocation5 + $0x40] ss:$24 sps:$4 sm:$0xff]   ;;  %v1457_v40 = vld [vmem:[#allocation5 + $0x70] ss:$24 sps:$4 sm:$0xff]   ;;  %p1552_p10 = scmp.ne.s32.totalorder %s1053_s22, %s1551_s23  ;;  %p1557_p12 = scmp.lt.s32.totalorder %s1551_s23, %s1551_s23 }
  0x4f   :  { %1244 = vmatpush3.bf16.msra.mxu1 %v1423_v28  ;;  %v1447_v28 = vld [vmem:[#allocation7] sm:$0xff]  }
  0x50   :  { %1245 = vmatprep.subr.bf16.mxu1 %v1659_v1  ;;  %p1558_p13 = por %p1557_p12, %p1556_p11 }
  0x51   :  { %194 = vmatpush1.bf16.msra.mxu0 %v1408_v15 }
  0x52   :  { %195 = vmatprep.subr.bf16.mxu0 %v1409_v17  ;;  %p1559_p0 = pnand %p1558_p13, %p1552_p10 }
  0x53   :  { %1246 = vmatpush3.bf16.msra.mxu1 %v1425_v30 }
  0x54   :  { %1247 = vmatprep.subr.bf16.mxu1 %v1659_v1 }
  0x55   :  { %196 = vmatpush1.bf16.msra.mxu0 %v1411_v19 }
  0x56   :  { %197 = vmatprep.subr.bf16.mxu0 %v1412_v20 }
  0x57   :  { %1248 = vmatpush3.bf16.msra.mxu1 %v1427_v32  ;;  %v1449_v32 = vld [vmem:[#allocation7 + $0x10] sm:$0xff]  }
  0x58   :  { %1249 = vmatprep.subr.bf16.mxu1 %v1659_v1 }
  0x59   :  { %198 = vmatpush1.bf16.msra.mxu0 %v1414_v21 }
  0x5a   :  { %1255 = vmatprep.subr.bf16.mxu0 %v1659_v1 }
  0x5b   :  { %1250 = vmatpush3.bf16.msra.mxu1 %v1429_v34  ;;  %v1451_v34 = vld [vmem:[#allocation7 + $0x20] sm:$0xff]  }
  0x5c   :  { %216 = vmatmul.mubr.bf16.vlgmr.msra.gmra.mrb[0].mxu0 %v90_v24  ;;  %1275 = vmatprep.subr.bf16.mxu1 %v1659_v1 }
  0x5d   :  { %1256 = vmatpush3.bf16.msra.mxu0 %v1416_v23  ;;  %1271 = vmatprep.mubr.msk.bf16.mxu0 %vm1660_vm0, %v1659_v1 }
  0x5e   :  { %1257 = vmatprep.subr.bf16.mxu0 %v1659_v1 }
  0x61   :  { %1258 = vmatpush3.bf16.msra.mxu0 %v1418_v25 }
  0x62   :  { %1259 = vmatprep.subr.bf16.mxu0 %v1659_v1 }
  0x65   :  { %1260 = vmatpush3.bf16.msra.mxu0 %v1420_v26 }
  0x66   :  { %1261 = vmatprep.subr.bf16.mxu0 %v1659_v1 }
  0x69   :  { %1262 = vmatpush3.bf16.msra.mxu0 %v1422_v27 }
  0x6a   :  { %1263 = vmatprep.subr.bf16.mxu0 %v1659_v1 }
  0x6d   :  { %1264 = vmatpush3.bf16.msra.mxu0 %v1424_v29 }
  0x6e   :  { %1265 = vmatprep.subr.bf16.mxu0 %v1659_v1 }
  0x71   :  { %1266 = vmatpush3.bf16.msra.mxu0 %v1426_v31  ;;  %v1448_v31 = vld [vmem:[#allocation7 + $0x8] sm:$0xff]  }
  0x72   :  { %1267 = vmatprep.subr.bf16.mxu0 %v1659_v1 }
  0x75   :  { %1268 = vmatpush3.bf16.msra.mxu0 %v1428_v33  ;;  %v1450_v33 = vld [vmem:[#allocation7 + $0x18] sm:$0xff]  }
  0x76   :  { %1269 = vmatprep.subr.bf16.mxu0 %v1659_v1 }
  0x79   :  { %1270 = vmatpush3.bf16.msra.mxu0 %v1430_v35  ;;  %v1452_v35 = vld [vmem:[#allocation7 + $0x28] sm:$0xff]  }
  0x7a   :  { %1295 = vmatprep.subr.bf16.mxu0 %v1659_v1 }
 0x12f   :  { %v217_v43 = vpop.f32.mrb[0].mxu0 }
 0x130   :  { %v218_v44 = vadd.f32 %v217_v43, %v96_v41  ;;  %v219_v45 = vpop.f32.mrb[1].mxu0  ;;  %v1458_v41 = vld [vmem:[#allocation5 + $0xa0] ss:$24 sps:$4 sm:$0xff]   ;;  %v1136_v43 = vld [vmem:[%s1904_s5 + $0x5] ss:$0 sm:$0xff] }
 0x131   :  { %v220_v46 = vadd.f32 %v219_v45, %v100_v42  ;;  %v221_v47 = vpop.f32.mrb[2].mxu0  ;;  %v1127_v42 = vld [vmem:[%s1904_s5 + $0x4] ss:$0 sm:$0xff] }
 0x132   :  { %1471 = vtanh.f32 %v218_v44  ;;  %v222_v48 = vpop.f32.mrb[3].mxu0  ;;  %v226_v49 = vmul.f32 0.1, %v218_v44 }
 0x133   :  { %1473 = vtanh.f32 %v220_v46  ;;  %v227_v51 = vmul.f32 0.1, %v220_v46 }
 0x13c   :  { %v1472_v50 = vpop.eup %1471 }
 0x13d   :  { %v1474_v52 = vpop.eup %1473  ;;  %v228_v53 = vadd.f32 %v1472_v50, %v226_v49 }
 0x13e   :  { %v229_v54 = vadd.f32 %v1474_v52, %v227_v51 }
 0x13f   :  { %v246_v56 = vpack.c.bf16 %v228_v53, %v228_v53 }
 0x140   :  { %v361_v58 = vpack.c.bf16 %v229_v54, %v229_v54 }
 0x141   :  { %1252 = vmatmul.mubr.bf16.vlgmr.msra.gmra.mrb[0].mxu1 %v246_v56  ;;  %v73_v56 = vld [vmem:[%s1900_s1] sm:$0xff] }
 0x142   :  { %1272 = vmatmul.mubr.bf16.vlgmr.msra.gmra.mrb[4].mxu0 %v361_v58  ;;  %1276 = vmatpush3.bf16.msra.mxu1 %v1431_v55 }
 0x143   :  { %1296 = vmatpush3.bf16.msra.mxu0 %v1432_v57  ;;  %1277 = vmatprep.subr.bf16.mxu1 %v1659_v1 }
 0x144   :  { %1297 = vmatprep.subr.bf16.mxu0 %v1659_v1  ;;  %1291 = vmatprep.mubr.msk.bf16.mxu1 %vm1660_vm0, %v1659_v1 }
 0x145   :  { %1311 = vmatprep.mubr.msk.bf16.mxu0 %vm1660_vm0, %v1659_v1 }
 0x146   :  { %1278 = vmatpush3.bf16.msra.mxu1 %v1433_v59 }
 0x147   :  { %1298 = vmatpush3.bf16.msra.mxu0 %v1434_v60  ;;  %1279 = vmatprep.subr.bf16.mxu1 %v1659_v1 }
 0x148   :  { %1299 = vmatprep.subr.bf16.mxu0 %v1659_v1 }
 0x14a   :  { %1280 = vmatpush3.bf16.msra.mxu1 %v1435_v61 }
 0x14b   :  { %1300 = vmatpush3.bf16.msra.mxu0 %v1436_v62  ;;  %1281 = vmatprep.subr.bf16.mxu1 %v1659_v1  ;;  %v1459_v62 = vld [vmem:[#allocation5 + $0xd0] ss:$24 sps:$4 sm:$0xff]  }
 0x14c   :  { %1301 = vmatprep.subr.bf16.mxu0 %v1659_v1 }
 0x14e   :  { %1282 = vmatpush3.bf16.msra.mxu1 %v1437_v63  ;;  %v1460_v63 = vld [vmem:[#allocation5 + $0x100] ss:$24 sps:$4 sm:$0xff]  }
 0x14f   :  { %1283 = vmatprep.subr.bf16.mxu1 %v1659_v1  ;;  %1302 = vmatpush3.bf16.msra.mxu0 %v1438_v0  ;;  %v1461_v0 = vld [vmem:[#allocation5 + $0x130] ss:$24 sps:$4 sm:$0xff]  }
 0x150   :  { %1303 = vmatprep.subr.bf16.mxu0 %v1659_v1 }
 0x152   :  { %1284 = vmatpush3.bf16.msra.mxu1 %v1439_v2  ;;  %v1462_v2 = vld [vmem:[#allocation5 + $0x160] ss:$24 sps:$4 sm:$0xff]  }
 0x153   :  { %1304 = vmatpush3.bf16.msra.mxu0 %v1440_v3  ;;  %1285 = vmatprep.subr.bf16.mxu1 %v1659_v1  ;;  %v1463_v3 = vld [vmem:[#allocation5 + $0x14] ss:$24 sps:$4 sm:$0xff]  }
 0x154   :  { %1305 = vmatprep.subr.bf16.mxu0 %v1659_v1 }
 0x156   :  { %1286 = vmatpush3.bf16.msra.mxu1 %v1441_v4  ;;  %v1464_v4 = vld [vmem:[#allocation5 + $0x44] ss:$24 sps:$4 sm:$0xff]  }
 0x157   :  { %1306 = vmatpush3.bf16.msra.mxu0 %v1442_v5  ;;  %1287 = vmatprep.subr.bf16.mxu1 %v1659_v1  ;;  %v1465_v5 = vld [vmem:[#allocation5 + $0x74] ss:$24 sps:$4 sm:$0xff]  }
 0x158   :  { %1307 = vmatprep.subr.bf16.mxu0 %v1659_v1 }
 0x15a   :  { %1288 = vmatpush3.bf16.msra.mxu1 %v1443_v6  ;;  %v1466_v6 = vld [vmem:[#allocation5 + $0xa4] ss:$24 sps:$4 sm:$0xff]  }
 0x15b   :  { %1308 = vmatpush3.bf16.msra.mxu0 %v1444_v7  ;;  %1289 = vmatprep.subr.bf16.mxu1 %v1659_v1  ;;  %v1145_v7 = vld [vmem:[%s1904_s5 + $0x6] ss:$0 sm:$0xff] }
 0x15c   :  { %1309 = vmatprep.subr.bf16.mxu0 %v1659_v1 }
 0x15e   :  { %1290 = vmatpush3.bf16.msra.mxu1 %v1445_v8 }
 0x15f   :  { %1310 = vmatpush3.bf16.msra.mxu0 %v1446_v9  ;;  %1315 = vmatprep.subr.bf16.mxu1 %v1659_v1 }
 0x160   :  { %1335 = vmatprep.subr.bf16.mxu0 %v1659_v1 }
 0x214   :  { %v336_v12 = vpop.f32.mrb[0].mxu1 }
 0x215   :  { %v337_v13 = vadd.f32 %v1109_v10, %v336_v12  ;;  %v1253_v14 = vpop.f32.mrb[1].mxu1  ;;  %v451_v15 = vpop.f32.mrb[4].mxu0 }
 0x216   :  { %v452_v16 = vadd.f32 %v1118_v11, %v451_v15  ;;  %v339_v17 = vpop.f32.mrb[2].mxu1  ;;  %v1273_v18 = vpop.f32.mrb[5].mxu0 }
 0x217   :  { %1475 = vtanh.f32 %v337_v13  ;;  %v1254_v19 = vpop.f32.mrb[3].mxu1  ;;  %v454_v20 = vpop.f32.mrb[6].mxu0  ;;  %v343_v22 = vmul.f32 0.1, %v337_v13  ;;  %v1467_v17 = vld [vmem:[#allocation5 + $0xd4] ss:$24 sps:$4 sm:$0xff]  }
 0x218   :  { %1477 = vtanh.f32 %v452_v16  ;;  %v1274_v21 = vpop.f32.mrb[7].mxu0  ;;  %v458_v24 = vmul.f32 0.1, %v452_v16  ;;  %v1468_v18 = vld [vmem:[#allocation5 + $0x104] ss:$24 sps:$4 sm:$0xff]  }
 0x219   :  { %v1469_v19 = vld [vmem:[#allocation5 + $0x134] ss:$24 sps:$4 sm:$0xff]   ;;  %v1470_v20 = vld [vmem:[#allocation5 + $0x164] ss:$24 sps:$4 sm:$0xff]  }
 0x21a   :  { %v1154_v21 = vld [vmem:[%s1904_s5 + $0x7] ss:$0 sm:$0xff] }
 0x221   :  { %v1476_v23 = vpop.eup %1475 }
 0x222   :  { %v1478_v25 = vpop.eup %1477  ;;  %v344_v26 = vadd.f32 %v1476_v23, %v343_v22 }
 0x223   :  { %v459_v27 = vadd.f32 %v1478_v25, %v458_v24 }
 0x224   :  { %v476_v29 = vpack.c.bf16 %v344_v26, %v344_v26 }
 0x225   :  { %v588_v30 = vpack.c.bf16 %v459_v27, %v459_v27 }
 0x226   :  { %1292 = vmatmul.mubr.bf16.vlgmr.msra.gmra.mrb[4].mxu1 %v476_v29 }
 0x227   :  { %1312 = vmatmul.mubr.bf16.vlgmr.msra.gmra.mrb[8].mxu0 %v588_v30  ;;  %1316 = vmatpush3.bf16.msra.mxu1 %v1447_v28 }
 0x228   :  { %1317 = vmatprep.subr.bf16.mxu1 %v1659_v1  ;;  %1331 = vmatprep.mubr.msk.bf16.mxu1 %vm1660_vm0, %v1659_v1 }
 0x229   :  { %1351 = vmatprep.mubr.msk.bf16.mxu0 %vm1660_vm0, %v1659_v1  ;;  %1336 = vmatpush3.bf16.msra.mxu0 %v1455_v38 }
 0x22a   :  { %1337 = vmatprep.subr.bf16.mxu0 %v1659_v1 }
 0x22b   :  { %1318 = vmatpush3.bf16.msra.mxu1 %v1448_v31 }
 0x22c   :  { %1319 = vmatprep.subr.bf16.mxu1 %v1659_v1 }
 0x22d   :  { %1338 = vmatpush3.bf16.msra.mxu0 %v1456_v39 }
 0x22e   :  { %1339 = vmatprep.subr.bf16.mxu0 %v1659_v1 }
 0x22f   :  { %1320 = vmatpush3.bf16.msra.mxu1 %v1449_v32 }
 0x230   :  { %1321 = vmatprep.subr.bf16.mxu1 %v1659_v1 }
 0x231   :  { %1340 = vmatpush3.bf16.msra.mxu0 %v1457_v40 }
 0x232   :  { %1341 = vmatprep.subr.bf16.mxu0 %v1659_v1 }
 0x233   :  { %1322 = vmatpush3.bf16.msra.mxu1 %v1450_v33 }
 0x234   :  { %1323 = vmatprep.subr.bf16.mxu1 %v1659_v1 }
 0x235   :  { %1342 = vmatpush3.bf16.msra.mxu0 %v1458_v41 }
 0x236   :  { %1343 = vmatprep.subr.bf16.mxu0 %v1659_v1 }
 0x237   :  { %1324 = vmatpush3.bf16.msra.mxu1 %v1451_v34 }
 0x238   :  { %1325 = vmatprep.subr.bf16.mxu1 %v1659_v1 }
 0x239   :  { %1344 = vmatpush3.bf16.msra.mxu0 %v1459_v62 }
 0x23a   :  { %1345 = vmatprep.subr.bf16.mxu0 %v1659_v1 }
 0x23b   :  { %1326 = vmatpush3.bf16.msra.mxu1 %v1452_v35 }
 0x23c   :  { %1327 = vmatprep.subr.bf16.mxu1 %v1659_v1 }
 0x23d   :  { %1346 = vmatpush3.bf16.msra.mxu0 %v1460_v63 }
 0x23e   :  { %1347 = vmatprep.subr.bf16.mxu0 %v1659_v1 }
 0x23f   :  { %1328 = vmatpush3.bf16.msra.mxu1 %v1453_v36 }
 0x240   :  { %1329 = vmatprep.subr.bf16.mxu1 %v1659_v1 }
 0x241   :  { %1348 = vmatpush3.bf16.msra.mxu0 %v1461_v0 }
 0x242   :  { %1349 = vmatprep.subr.bf16.mxu0 %v1659_v1 }
 0x243   :  { %1330 = vmatpush3.bf16.msra.mxu1 %v1454_v37 }
 0x244   :  { %1355 = vmatprep.subr.bf16.mxu1 %v1659_v1 }
 0x245   :  { %1350 = vmatpush3.bf16.msra.mxu0 %v1462_v2 }
 0x2f9   :  { %v566_v44 = vpop.f32.mrb[4].mxu1 }
 0x2fa   :  { %v567_v45 = vadd.f32 %v1127_v42, %v566_v44  ;;  %v1293_v46 = vpop.f32.mrb[5].mxu1  ;;  %v678_v47 = vpop.f32.mrb[8].mxu0 }
 0x2fb   :  { %v679_v48 = vadd.f32 %v1136_v43, %v678_v47  ;;  %v569_v49 = vpop.f32.mrb[6].mxu1  ;;  %v1313_v50 = vpop.f32.mrb[9].mxu0 }
 0x2fc   :  { %1033 = vst [vmem:[#allocation9] sm:$0xff] %v567_v45  ;;  %v1294_v51 = vpop.f32.mrb[7].mxu1  ;;  %v681_v52 = vpop.f32.mrb[10].mxu0 }
 0x2fd   :  { %v684_v53 = vmul.f32 0.5, %v679_v48  ;;  %v1314_v54 = vpop.f32.mrb[11].mxu0 }
 0x2ff   :  { %v685_v55 = vmul.f32 1.442695, %v684_v53 }
 0x301   :  { %1479 = vpow2.f32 %v685_v55 }
 0x30b   :  { %v1480_v57 = vpop.eup %1479 }
 0x30c   :  { %v688_v58 = vmul.f32 %v1480_v57, %v73_v56  ;;  %v687_v59 = vmul.f32 %v1480_v57, %v1480_v57 }
 0x30e   :  { %v689_v60 = vadd.f32 %v688_v58, %v567_v45  ;;  %1034 = vst [vmem:[#allocation11] sm:$0xff] %v687_v59 }
 0x310   :  { %v706_v61 = vpack.c.bf16 %v689_v60, %v689_v60  ;;  %1035 = vst [vmem:[#allocation12] sm:$0xff] %v689_v60 }
 0x312   :  { %1332 = vmatmul.mubr.bf16.vlgmr.msra.gmra.mrb[8].mxu1 %v706_v61 }
 0x313   :  { %1371 = vmatprep.mubr.msk.bf16.mxu1 %vm1660_vm0, %v1659_v1  ;;  %1356 = vmatpush3.bf16.msra.mxu1 %v1463_v3 }
 0x314   :  { %1357 = vmatprep.subr.bf16.mxu1 %v1659_v1 }
 0x317   :  { %1358 = vmatpush3.bf16.msra.mxu1 %v1464_v4 }
 0x318   :  { %1359 = vmatprep.subr.bf16.mxu1 %v1659_v1 }
 0x31b   :  { %1360 = vmatpush3.bf16.msra.mxu1 %v1465_v5 }
 0x31c   :  { %1361 = vmatprep.subr.bf16.mxu1 %v1659_v1 }
 0x31f   :  { %1362 = vmatpush3.bf16.msra.mxu1 %v1466_v6 }
 0x320   :  { %1363 = vmatprep.subr.bf16.mxu1 %v1659_v1 }
 0x323   :  { %1364 = vmatpush3.bf16.msra.mxu1 %v1467_v17 }
 0x324   :  { %1365 = vmatprep.subr.bf16.mxu1 %v1659_v1 }
 0x327   :  { %1366 = vmatpush3.bf16.msra.mxu1 %v1468_v18 }
 0x328   :  { %1367 = vmatprep.subr.bf16.mxu1 %v1659_v1 }
 0x32b   :  { %1368 = vmatpush3.bf16.msra.mxu1 %v1469_v19 }
 0x32c   :  { %1369 = vmatprep.subr.bf16.mxu1 %v1659_v1 }
 0x32f   :  { %1370 = vmatpush3.bf16.msra.mxu1 %v1470_v20 }
 0x3e5   :  { %v796_v8 = vpop.f32.mrb[8].mxu1 }
 0x3e6   :  { %v797_v9 = vadd.f32 %v1145_v7, %v796_v8  ;;  %v1333_v10 = vpop.f32.mrb[9].mxu1 }
 0x3e7   :  { %v799_v11 = vpop.f32.mrb[10].mxu1 }
 0x3e8   :  { %1481 = vtanh.f32 %v797_v9  ;;  %v1334_v12 = vpop.f32.mrb[11].mxu1  ;;  %v803_v13 = vmul.f32 0.1, %v797_v9 }
 0x3f2   :  { %v1482_v14 = vpop.eup %1481 }
 0x3f3   :  { %v804_v15 = vadd.f32 %v1482_v14, %v803_v13 }
 0x3f5   :  { %v821_v16 = vpack.c.bf16 %v804_v15, %v804_v15 }
 0x3f7   :  { %1352 = vmatmul.mubr.bf16.vlgmr.msra.gmra.mrb[12].mxu0 %v821_v16 }
 0x4ca   :  { %v911_v22 = vpop.f32.mrb[12].mxu0 }
 0x4cb   :  { %v912_v23 = vadd.f32 %v1154_v21, %v911_v22  ;;  %v1353_v24 = vpop.f32.mrb[13].mxu0 }
 0x4cc   :  { %v914_v25 = vpop.f32.mrb[14].mxu0 }
 0x4cd   :  { %1483 = vtanh.f32 %v912_v23  ;;  %v1354_v26 = vpop.f32.mrb[15].mxu0  ;;  %v918_v27 = vmul.f32 0.1, %v912_v23 }
 0x4d7   :  { %v1484_v28 = vpop.eup %1483 }
 0x4d8   :  { %v919_v29 = vadd.f32 %v1484_v28, %v918_v27 }
 0x4da   :  { %v936_v30 = vpack.c.bf16 %v919_v29, %v919_v29 }
 0x4dc   :  { %1372 = vmatmul.mubr.bf16.vlgmr.msra.gmra.mrb[12].mxu1 %v936_v30 }
 0x4dd   :  { %1562 = shalt.err (!%p1559_p0)
}
 0x4de   :  { %s1563_s24 = scalar_lea.hbm %s1906_s7, 128 }
 0x4df   :  { %p1564_p1 = scmp.ne.s32.totalorder %s1906_s7, %s1563_s24  ;;  %p1567_p2 = scmp.lt.u32.totalorder %s1563_s24, %s1906_s7 }
 0x4e1   :  { %p1569_p3 = pnand %p1567_p2, %p1564_p1 }
 0x4e3   :  { %1572 = shalt.err (!%p1569_p3)
}
 0x4e4   :  { %1055 = dma.vmem_to_hbm [thread:$0]  %s1053_s22, 128, %s1906_s7, [#allocation10]  }
 0x4e5   :  { %s1662_s30 = smov [#allocation11]   ;;  %s1663_s12 = smov [#allocation12]  }
 0x4e6   :  { %s1062_s11 = sshll.u32 %s1662_s30, 4  ;;  %s1072_s3 = sshll.u32 %s1663_s12, 4  ;;  %s1063_s11 = int_to_ptr.vmem [resolvable:$true] %s1062_s11  ;;  %s1073_s3 = int_to_ptr.vmem [resolvable:$true] %s1072_s3 }
 0x4e7   :  { %s1573_s10 = scalar_lea.vmem %s1063_s11, 128  ;;  %p1578_p5 = scmp.lt.s32.totalorder %s1063_s11, %s1063_s11 }
 0x4e8   :  { %p1574_p4 = scmp.ne.s32.totalorder %s1063_s11, %s1573_s10  ;;  %p1579_p6 = scmp.lt.s32.totalorder %s1573_s10, %s1573_s10 }
 0x4ea   :  { %p1580_p7 = por %p1579_p6, %p1578_p5 }
 0x4ec   :  { %p1581_p8 = pnand %p1580_p7, %p1574_p4 }
 0x4ee   :  { %1584 = shalt.err (!%p1581_p8)
}
 0x4ef   :  { %s1585_s15 = scalar_lea.hbm %s1907_s8, 128 }
 0x4f0   :  { %p1586_p9 = scmp.ne.s32.totalorder %s1907_s8, %s1585_s15  ;;  %p1589_p10 = scmp.lt.u32.totalorder %s1585_s15, %s1907_s8 }
 0x4f2   :  { %p1591_p11 = pnand %p1589_p10, %p1586_p9 }
 0x4f4   :  { %1594 = shalt.err (!%p1591_p11)
}
 0x4f5   :  { %1065 = dma.vmem_to_hbm [thread:$0]  %s1063_s11, 128, %s1907_s8, [#allocation10]  }
 0x4f6   :  { %s1595_s20 = scalar_lea.vmem %s1073_s3, 128  ;;  %p1600_p13 = scmp.lt.s32.totalorder %s1073_s3, %s1073_s3 }
 0x4f7   :  { %p1596_p12 = scmp.ne.s32.totalorder %s1073_s3, %s1595_s20  ;;  %p1601_p0 = scmp.lt.s32.totalorder %s1595_s20, %s1595_s20 }
 0x4f9   :  { %p1602_p1 = por %p1601_p0, %p1600_p13 }
 0x4fb   :  { %p1603_p2 = pnand %p1602_p1, %p1596_p12 }
 0x4fd   :  { %1606 = shalt.err (!%p1603_p2)
}
 0x4fe   :  { %s1607_s23 = scalar_lea.hbm %s1908_s9, 128 }
 0x4ff   :  { %p1608_p3 = scmp.ne.s32.totalorder %s1908_s9, %s1607_s23  ;;  %p1611_p4 = scmp.lt.u32.totalorder %s1607_s23, %s1908_s9 }
 0x501   :  { %p1613_p5 = pnand %p1611_p4, %p1608_p3 }
 0x503   :  { %1616 = shalt.err (!%p1613_p5)
}
 0x504   :  { %1075 = dma.vmem_to_hbm [thread:$0]  %s1073_s3, 128, %s1908_s9, [#allocation13]   ;;  %v1163_v1 = vld [vmem:[%s1904_s5 + $0x8] ss:$0 sm:$0xff] }
 0x505   :  { %s1664_s0 = smov [#allocation8]  }
 0x506   :  { %s1042_s29 = sshll.u32 %s1664_s0, 4  ;;  %s1043_s29 = int_to_ptr.vmem [resolvable:$true] %s1042_s29 }
 0x507   :  { %s1617_s30 = scalar_lea.vmem %s1043_s29, 128  ;;  %p1622_p7 = scmp.lt.s32.totalorder %s1043_s29, %s1043_s29 }
 0x508   :  { %p1618_p6 = scmp.ne.s32.totalorder %s1043_s29, %s1617_s30  ;;  %p1623_p8 = scmp.lt.s32.totalorder %s1617_s30, %s1617_s30 }
 0x50a   :  { %p1624_p9 = por %p1623_p8, %p1622_p7 }
 0x50c   :  { %p1625_p10 = pnand %p1624_p9, %p1618_p6 }
 0x5af   :  { %v1026_v31 = vpop.f32.mrb[12].mxu1 }
 0x5b0   :  { %v1027_v32 = vadd.f32 %v1163_v1, %v1026_v31  ;;  %v1373_v33 = vpop.f32.mrb[13].mxu1 }
 0x5b1   :  { %v1029_v34 = vpop.f32.mrb[14].mxu1 }
 0x5b2   :  { %1032 = vst [vmem:[#allocation8] sm:$0xff] %v1027_v32  ;;  %v1374_v35 = vpop.f32.mrb[15].mxu1 }
 0x5b3   :  { %1628 = shalt.err (!%p1625_p10)
}
 0x5b4   :  { %s1629_s5 = scalar_lea.hbm %s1905_s6, 128 }
 0x5b5   :  { %p1630_p11 = scmp.ne.s32.totalorder %s1905_s6, %s1629_s5  ;;  %p1633_p12 = scmp.lt.u32.totalorder %s1629_s5, %s1905_s6 }
 0x5b7   :  { %p1635_p13 = pnand %p1633_p12, %p1630_p11 }
 0x5b9   :  { %1638 = shalt.err (!%p1635_p13)
}
 0x5ba   :  { %1045 = dma.vmem_to_hbm [thread:$0]  %s1043_s29, 128, %s1905_s6, [#allocation4]  }
 0x5bb   :  { %1643 = dma.done.wait [#allocation4], 128  }
 0x5bc   :  { %1644 = vsyncadd [#allocation4], 4294967168 }
 0x5bd   :  { %1645 = dma.done.wait [#allocation10], 256  }
 0x5be   :  { %1646 = vsyncadd [#allocation10], 4294967040 }
 0x5bf   :  { %1647 = dma.done.wait [#allocation13], 128  }
 0x5c0   :  { %1648 = vsyncadd [#allocation13], 4294967168 }
 0x5c1   :  { %1088 = vsyncpa [#allocation3], 1 }
 0x5c2   :  { %1089 = vsyncpa [#allocation6], 1 }
 0x5c3   :  { %1090 = vsyncpa [#allocation4], 1 }
 0x5c4   :  { %1091 = vsyncpa [#allocation10], 1 }
 0x5c5   :  { %1092 = vsyncpa [#allocation13], 1 }

// kernel: clean_vae_forward.1
= control target key start
LH: loop header
LB: loop body
LE: loop exit
PB: predicated region body
PF: predicated region fallthrough
CT: control target
= control target key end

     0   :  { %15 = vsyncpa [#allocation3], 0  ;;  %s1899_s0 = inlined_call_operand.vmem [shape: f32[8,128], index: 0, kind: input, shape index: {}]   ;;  %s1900_s1 = inlined_call_operand.vmem [shape: f32[8,128], index: 1, kind: input, shape index: {}]   ;;  %s1901_s2 = inlined_call_operand.hbm [shape: bf16[128,256], index: 2, kind: input, shape index: {}]   ;;  %s1902_s3 = inlined_call_operand.hbm [shape: bf16[128,768], index: 3, kind: input, shape index: {}]   ;;  %s1903_s4 = inlined_call_operand.hbm [shape: bf16[128,128], index: 4, kind: input, shape index: {}]   ;;  %s1904_s5 = inlined_call_operand.vmem [shape: f32[1,1152], index: 5, kind: input, shape index: {}]   ;;  %s1905_s6 = inlined_call_operand.hbm [shape: f32[8,128], index: 6, kind: output, shape index: {0}]   ;;  %s1906_s7 = inlined_call_operand.hbm [shape: f32[8,128], index: 7, kind: output, shape index: {1}]   ;;  %s1907_s8 = inlined_call_operand.hbm [shape: f32[8,128], index: 8, kind: output, shape index: {2}]   ;;  %s1908_s9 = inlined_call_operand.hbm [shape: f32[8,128], index: 9, kind: output, shape index: {3}]  }
   0x1   :  { %16 = vsyncpa [#allocation6], 0 }
   0x2   :  { %17 = vsyncpa [#allocation4], 0 }
   0x3   :  { %18 = vsyncpa [#allocation10], 0 }
   0x4   :  { %19 = vsyncpa [#allocation13], 0  ;;  %s1649_s30 = smov [#allocation5]   ;;  %s1485_s13 = scalar_lea.hbm %s1902_s3, 6144 }
   0x5   :  { %s41_s10 = sshll.u32 %s1649_s30, 4  ;;  %p1486_p0 = scmp.ne.s32.totalorder %s1902_s3, %s1485_s13  ;;  %s42_s10 = int_to_ptr.vmem [resolvable:$true] %s41_s10 }
   0x6   :  { %p1489_p1 = scmp.lt.u32.totalorder %s1485_s13, %s1902_s3 }
   0x8   :  { %p1491_p2 = pnand %p1489_p1, %p1486_p0 }
   0xa   :  { %1494 = shalt.err (!%p1491_p2)
}
   0xb   :  { %s1495_s18 = scalar_lea.vmem %s42_s10, 6144  ;;  %p1500_p4 = scmp.lt.s32.totalorder %s42_s10, %s42_s10 }
   0xc   :  { %p1496_p3 = scmp.ne.s32.totalorder %s42_s10, %s1495_s18  ;;  %p1501_p5 = scmp.lt.s32.totalorder %s1495_s18, %s1495_s18 }
   0xe   :  { %p1502_p6 = por %p1501_p5, %p1500_p4 }
  0x10   :  { %p1503_p7 = pnand %p1502_p6, %p1496_p3 }
  0x12   :  { %1506 = shalt.err (!%p1503_p7)
}
  0x13   :  { %s1650_s19 = smov 384   ;;  %s1651_s20 = smov 24  }
  0x14   :  { %47 = dma.hbm_to_vmem [thread:$0]  %s1902_s3, 6144, %s42_s10, [#allocation6], %s1650_s19, %s1650_s19, %s1651_s20  }
  0x15   :  { %s1652_s23 = smov [#allocation2]   ;;  %s1507_s27 = scalar_lea.hbm %s1901_s2, 2048 }
  0x16   :  { %s29_s24 = sshll.u32 %s1652_s23, 4  ;;  %p1508_p8 = scmp.ne.s32.totalorder %s1901_s2, %s1507_s27  ;;  %s30_s24 = int_to_ptr.vmem [resolvable:$true] %s29_s24 }
  0x17   :  { %p1511_p9 = scmp.lt.u32.totalorder %s1507_s27, %s1901_s2 }
  0x19   :  { %p1513_p10 = pnand %p1511_p9, %p1508_p8 }
  0x1b   :  { %1516 = shalt.err (!%p1513_p10)
}
  0x1c   :  { %s1517_s12 = scalar_lea.vmem %s30_s24, 2048  ;;  %p1522_p12 = scmp.lt.s32.totalorder %s30_s24, %s30_s24 }
  0x1d   :  { %p1518_p11 = scmp.ne.s32.totalorder %s30_s24, %s1517_s12  ;;  %p1523_p13 = scmp.lt.s32.totalorder %s1517_s12, %s1517_s12 }
  0x1f   :  { %p1524_p0 = por %p1523_p13, %p1522_p12 }
  0x21   :  { %p1525_p1 = pnand %p1524_p0, %p1518_p11 }
  0x23   :  { %1528 = shalt.err (!%p1525_p1)
}
  0x24   :  { %s1653_s3 = smov 128   ;;  %s1654_s10 = smov 8  }
  0x25   :  { %35 = dma.hbm_to_vmem [thread:$0]  %s1901_s2, 2048, %s30_s24, [#allocation3], %s1653_s3, %s1653_s3, %s1654_s10  }
  0x26   :  { %s1655_s15 = smov [#allocation7]   ;;  %s1529_s19 = scalar_lea.hbm %s1903_s4, 1024 }
  0x27   :  { %s53_s16 = sshll.u32 %s1655_s15, 4  ;;  %p1530_p2 = scmp.ne.s32.totalorder %s1903_s4, %s1529_s19  ;;  %s54_s16 = int_to_ptr.vmem [resolvable:$true] %s53_s16 }
  0x28   :  { %p1533_p3 = scmp.lt.u32.totalorder %s1529_s19, %s1903_s4 }
  0x2a   :  { %p1535_p4 = pnand %p1533_p3, %p1530_p2 }
  0x2c   :  { %1538 = shalt.err (!%p1535_p4)
}
  0x2d   :  { %s1539_s25 = scalar_lea.vmem %s54_s16, 1024  ;;  %p1544_p6 = scmp.lt.s32.totalorder %s54_s16, %s54_s16 }
  0x2e   :  { %p1540_p5 = scmp.ne.s32.totalorder %s54_s16, %s1539_s25  ;;  %p1545_p7 = scmp.lt.s32.totalorder %s1539_s25, %s1539_s25 }
  0x30   :  { %p1546_p8 = por %p1545_p7, %p1544_p6 }
  0x32   :  { %p1547_p9 = pnand %p1546_p8, %p1540_p5 }
  0x34   :  { %1550 = shalt.err (!%p1547_p9)
}
  0x35   :  { %s1656_s2 = smov 64   ;;  %s1657_s24 = smov 4  }
  0x36   :  { %59 = dma.hbm_to_vmem [thread:$0]  %s1903_s4, 1024, %s54_s16, [#allocation6], %s1656_s2, %s1656_s2, %s1657_s24  }
  0x37   :  { %1639 = dma.done.wait [#allocation3], 2048  }
  0x38   :  { %1640 = vsyncadd [#allocation3], 4294965248 }
  0x39   :  { %1641 = dma.done.wait [#allocation6], 7168  }
  0x3a   :  { %1642 = vsyncadd [#allocation6], 4294960128  ;;  %v1658_v0 = vmov 0   ;;  %v1659_v1 = vmov 0.0   ;;  %v1391_v2 = vld [vmem:[#allocation2 + $0x4] ss:$8 sps:$4 sm:$0xff]   ;;  %v93_v36 = vlaneseq }
  0x3b   :  { %215 = vmatprep.mubr.bf16.mxu0 %v1658_v0  ;;  %1235 = vmatprep.subr.bf16.mxu1 %v1659_v1  ;;  %v1393_v3 = vld [vmem:[#allocation2] ss:$8 sps:$4 sm:$0xff]   ;;  %v1394_v4 = vld [vmem:[#allocation2 + $0x14] ss:$8 sps:$4 sm:$0xff]   ;;  %v1396_v5 = vld [vmem:[#allocation2 + $0x10] ss:$8 sps:$4 sm:$0xff]  }
  0x3c   :  { %183 = vmatprep.subr.bf16.mxu0 %v1391_v2  ;;  %v1397_v6 = vld [vmem:[#allocation2 + $0x24] ss:$8 sps:$4 sm:$0xff]   ;;  %v1399_v7 = vld [vmem:[#allocation2 + $0x20] ss:$8 sps:$4 sm:$0xff]   ;;  %v1400_v8 = vld [vmem:[#allocation2 + $0x34] ss:$8 sps:$4 sm:$0xff]  }
  0x3d   :  { %184 = vmatpush1.bf16.msra.mxu0 %v1393_v3  ;;  %v1402_v9 = vld [vmem:[#allocation2 + $0x30] ss:$8 sps:$4 sm:$0xff]   ;;  %v1403_v11 = vld [vmem:[#allocation2 + $0x44] ss:$8 sps:$4 sm:$0xff]   ;;  %v1405_v13 = vld [vmem:[#allocation2 + $0x40] ss:$8 sps:$4 sm:$0xff]  }
  0x3e   :  { %185 = vmatprep.subr.bf16.mxu0 %v1394_v4  ;;  %v1415_v10 = vld [vmem:[#allocation5] ss:$24 sps:$4 sm:$0xff]   ;;  %v1417_v12 = vld [vmem:[#allocation5 + $0x30] ss:$24 sps:$4 sm:$0xff]   ;;  %v1406_v14 = vld [vmem:[#allocation2 + $0x54] ss:$8 sps:$4 sm:$0xff]  }
  0x3f   :  { %1236 = vmatpush3.bf16.msra.mxu1 %v1415_v10  ;;  %v1408_v15 = vld [vmem:[#allocation2 + $0x50] ss:$8 sps:$4 sm:$0xff]   ;;  %v1409_v17 = vld [vmem:[#allocation2 + $0x64] ss:$8 sps:$4 sm:$0xff]   ;;  %v1411_v19 = vld [vmem:[#allocation2 + $0x60] ss:$8 sps:$4 sm:$0xff]  }
  0x40   :  { %1237 = vmatprep.subr.bf16.mxu1 %v1659_v1  ;;  %v1419_v16 = vld [vmem:[#allocation5 + $0x60] ss:$24 sps:$4 sm:$0xff]   ;;  %v1421_v18 = vld [vmem:[#allocation5 + $0x90] ss:$24 sps:$4 sm:$0xff]   ;;  %v1412_v20 = vld [vmem:[#allocation2 + $0x74] ss:$8 sps:$4 sm:$0xff]  }
  0x41   :  { %186 = vmatpush1.bf16.msra.mxu0 %v1396_v5  ;;  %v1414_v21 = vld [vmem:[#allocation2 + $0x70] ss:$8 sps:$4 sm:$0xff]   ;;  %v72_v22 = vld [vmem:[%s1899_s0] sm:$0xff]  ;;  %v1418_v25 = vld [vmem:[#allocation5 + $0x34] ss:$24 sps:$4 sm:$0xff]   ;;  %vm1660_vm0 = vmmov 0  }
  0x42   :  { %187 = vmatprep.subr.bf16.mxu0 %v1397_v6  ;;  %v1416_v23 = vld [vmem:[#allocation5 + $0x4] ss:$24 sps:$4 sm:$0xff]   ;;  %v90_v24 = vpack.c.bf16 %v72_v22, %v72_v22  ;;  %v1422_v27 = vld [vmem:[#allocation5 + $0x94] ss:$24 sps:$4 sm:$0xff]   ;;  %v1423_v28 = vld [vmem:[#allocation5 + $0xc0] ss:$24 sps:$4 sm:$0xff]   ;;  %1251 = vmatprep.mubr.msk.bf16.mxu1 %vm1660_vm0, %v1659_v1 }
  0x43   :  { %1238 = vmatpush3.bf16.msra.mxu1 %v1417_v12  ;;  %v1420_v26 = vld [vmem:[#allocation5 + $0x64] ss:$24 sps:$4 sm:$0xff]   ;;  %v1425_v30 = vld [vmem:[#allocation5 + $0xf0] ss:$24 sps:$4 sm:$0xff]   ;;  %v1426_v31 = vld [vmem:[#allocation5 + $0xf4] ss:$24 sps:$4 sm:$0xff]  }
  0x44   :  { %1239 = vmatprep.subr.bf16.mxu1 %v1659_v1  ;;  %v1424_v29 = vld [vmem:[#allocation5 + $0xc4] ss:$24 sps:$4 sm:$0xff]   ;;  %v1427_v32 = vld [vmem:[#allocation5 + $0x120] ss:$24 sps:$4 sm:$0xff]   ;;  %v1429_v34 = vld [vmem:[#allocation5 + $0x150] ss:$24 sps:$4 sm:$0xff]  }
  0x45   :  { %188 = vmatpush1.bf16.msra.mxu0 %v1399_v7  ;;  %v1428_v33 = vld [vmem:[#allocation5 + $0x124] ss:$24 sps:$4 sm:$0xff]   ;;  %v1430_v35 = vld [vmem:[#allocation5 + $0x154] ss:$24 sps:$4 sm:$0xff]   ;;  %v94_v37 = vshrl.u32 %v93_v36, 7  ;;  %s1661_s21 = smov [#allocation9]  }
  0x46   :  { %189 = vmatprep.subr.bf16.mxu0 %v1400_v8  ;;  %v91_v39 = vld [vmem:[%s1904_s5] sm:$0x3]  ;;  %v1432_v57 = vld [vmem:[#allocation5 + $0xc] ss:$24 sps:$4 sm:$0xff]   ;;  %v1433_v59 = vld [vmem:[#allocation5 + $0x38] ss:$24 sps:$4 sm:$0xff]  }
  0x47   :  { %1240 = vmatpush3.bf16.msra.mxu1 %v1419_v16  ;;  %v95_v38 = vsub.s32 0, %v94_v37  ;;  %v99_v40 = vsub.s32 1, %v94_v37  ;;  %v1431_v55 = vld [vmem:[#allocation5 + $0x8] ss:$24 sps:$4 sm:$0xff]   ;;  %v1434_v60 = vld [vmem:[#allocation5 + $0x3c] ss:$24 sps:$4 sm:$0xff]  }
  0x48   :  { %1241 = vmatprep.subr.bf16.mxu1 %v1659_v1  ;;  %v1435_v61 = vld [vmem:[#allocation5 + $0x68] ss:$24 sps:$4 sm:$0xff]   ;;  %v1436_v62 = vld [vmem:[#allocation5 + $0x6c] ss:$24 sps:$4 sm:$0xff]   ;;  %v1437_v63 = vld [vmem:[#allocation5 + $0x98] ss:$24 sps:$4 sm:$0xff]  }
  0x49   :  { %190 = vmatpush1.bf16.msra.mxu0 %v1402_v9  ;;  %v96_v41 = vrot.slane %v91_v39, %v95_v38  ;;  %v100_v42 = vrot.slane %v91_v39, %v99_v40  ;;  %v1438_v0 = vld [vmem:[#allocation5 + $0x9c] ss:$24 sps:$4 sm:$0xff]   ;;  %v1439_v2 = vld [vmem:[#allocation5 + $0xc8] ss:$24 sps:$4 sm:$0xff]   ;;  %v1440_v3 = vld [vmem:[#allocation5 + $0xcc] ss:$24 sps:$4 sm:$0xff]  }
  0x4a   :  { %191 = vmatprep.subr.bf16.mxu0 %v1403_v11  ;;  %v1441_v4 = vld [vmem:[#allocation5 + $0xf8] ss:$24 sps:$4 sm:$0xff]   ;;  %v1442_v5 = vld [vmem:[#allocation5 + $0xfc] ss:$24 sps:$4 sm:$0xff]   ;;  %v1443_v6 = vld [vmem:[#allocation5 + $0x128] ss:$24 sps:$4 sm:$0xff]  }
  0x4b   :  { %1242 = vmatpush3.bf16.msra.mxu1 %v1421_v18  ;;  %v1444_v7 = vld [vmem:[#allocation5 + $0x12c] ss:$24 sps:$4 sm:$0xff]   ;;  %v1445_v8 = vld [vmem:[#allocation5 + $0x158] ss:$24 sps:$4 sm:$0xff]   ;;  %v1446_v9 = vld [vmem:[#allocation5 + $0x15c] ss:$24 sps:$4 sm:$0xff]  }
  0x4c   :  { %1243 = vmatprep.subr.bf16.mxu1 %v1659_v1  ;;  %v1109_v10 = vld [vmem:[%s1904_s5 + $0x2] ss:$0 sm:$0xff]  ;;  %v1118_v11 = vld [vmem:[%s1904_s5 + $0x3] ss:$0 sm:$0xff]  ;;  %v1453_v36 = vld [vmem:[#allocation7 + $0x30] sm:$0xff]   ;;  %s1052_s22 = sshll.u32 %s1661_s21, 4  ;;  %s1053_s22 = int_to_ptr.vmem [resolvable:$true] %s1052_s22 }
  0x4d   :  { %192 = vmatpush1.bf16.msra.mxu0 %v1405_v13  ;;  %v1454_v37 = vld [vmem:[#allocation7 + $0x38] sm:$0xff]   ;;  %v1455_v38 = vld [vmem:[#allocation5 + $0x10] ss:$24 sps:$4 sm:$0xff]   ;;  %s1551_s23 = scalar_lea.vmem %s1053_s22, 128  ;;  %p1556_p11 = scmp.lt.s32.totalorder %s1053_s22, %s1053_s22 }
  0x4e   :  { %193 = vmatprep.subr.bf16.mxu0 %v1406_v14  ;;  %v1456_v39 = vld [vmem:[#allocation5 + $0x40] ss:$24 sps:$4 sm:$0xff]   ;;  %v1457_v40 = vld [vmem:[#allocation5 + $0x70] ss:$24 sps:$4 sm:$0xff]   ;;  %p1552_p10 = scmp.ne.s32.totalorder %s1053_s22, %s1551_s23  ;;  %p1557_p12 = scmp.lt.s32.totalorder %s1551_s23, %s1551_s23 }
  0x4f   :  { %1244 = vmatpush3.bf16.msra.mxu1 %v1423_v28  ;;  %v1447_v28 = vld [vmem:[#allocation7] sm:$0xff]  }
  0x50   :  { %1245 = vmatprep.subr.bf16.mxu1 %v1659_v1  ;;  %p1558_p13 = por %p1557_p12, %p1556_p11 }
  0x51   :  { %194 = vmatpush1.bf16.msra.mxu0 %v1408_v15 }
  0x52   :  { %195 = vmatprep.subr.bf16.mxu0 %v1409_v17  ;;  %p1559_p0 = pnand %p1558_p13, %p1552_p10 }
  0x53   :  { %1246 = vmatpush3.bf16.msra.mxu1 %v1425_v30 }
  0x54   :  { %1247 = vmatprep.subr.bf16.mxu1 %v1659_v1 }
  0x55   :  { %196 = vmatpush1.bf16.msra.mxu0 %v1411_v19 }
  0x56   :  { %197 = vmatprep.subr.bf16.mxu0 %v1412_v20 }
  0x57   :  { %1248 = vmatpush3.bf16.msra.mxu1 %v1427_v32  ;;  %v1449_v32 = vld [vmem:[#allocation7 + $0x10] sm:$0xff]  }
  0x58   :  { %1249 = vmatprep.subr.bf16.mxu1 %v1659_v1 }
  0x59   :  { %198 = vmatpush1.bf16.msra.mxu0 %v1414_v21 }
  0x5a   :  { %1255 = vmatprep.subr.bf16.mxu0 %v1659_v1 }
  0x5b   :  { %1250 = vmatpush3.bf16.msra.mxu1 %v1429_v34  ;;  %v1451_v34 = vld [vmem:[#allocation7 + $0x20] sm:$0xff]  }
  0x5c   :  { %216 = vmatmul.mubr.bf16.vlgmr.msra.gmra.mrb[0].mxu0 %v90_v24  ;;  %1275 = vmatprep.subr.bf16.mxu1 %v1659_v1 }
  0x5d   :  { %1256 = vmatpush3.bf16.msra.mxu0 %v1416_v23  ;;  %1271 = vmatprep.mubr.msk.bf16.mxu0 %vm1660_vm0, %v1659_v1 }
  0x5e   :  { %1257 = vmatprep.subr.bf16.mxu0 %v1659_v1 }
  0x61   :  { %1258 = vmatpush3.bf16.msra.mxu0 %v1418_v25 }
  0x62   :  { %1259 = vmatprep.subr.bf16.mxu0 %v1659_v1 }
  0x65   :  { %1260 = vmatpush3.bf16.msra.mxu0 %v1420_v26 }
  0x66   :  { %1261 = vmatprep.subr.bf16.mxu0 %v1659_v1 }
  0x69   :  { %1262 = vmatpush3.bf16.msra.mxu0 %v1422_v27 }
  0x6a   :  { %1263 = vmatprep.subr.bf16.mxu0 %v1659_v1 }
  0x6d   :  { %1264 = vmatpush3.bf16.msra.mxu0 %v1424_v29 }
  0x6e   :  { %1265 = vmatprep.subr.bf16.mxu0 %v1659_v1 }
  0x71   :  { %1266 = vmatpush3.bf16.msra.mxu0 %v1426_v31  ;;  %v1448_v31 = vld [vmem:[#allocation7 + $0x8] sm:$0xff]  }
  0x72   :  { %1267 = vmatprep.subr.bf16.mxu0 %v1659_v1 }
  0x75   :  { %1268 = vmatpush3.bf16.msra.mxu0 %v1428_v33  ;;  %v1450_v33 = vld [vmem:[#allocation7 + $0x18] sm:$0xff]  }
  0x76   :  { %1269 = vmatprep.subr.bf16.mxu0 %v1659_v1 }
  0x79   :  { %1270 = vmatpush3.bf16.msra.mxu0 %v1430_v35  ;;  %v1452_v35 = vld [vmem:[#allocation7 + $0x28] sm:$0xff]  }
  0x7a   :  { %1295 = vmatprep.subr.bf16.mxu0 %v1659_v1 }
 0x12f   :  { %v217_v43 = vpop.f32.mrb[0].mxu0 }
 0x130   :  { %v218_v44 = vadd.f32 %v217_v43, %v96_v41  ;;  %v219_v45 = vpop.f32.mrb[1].mxu0  ;;  %v1458_v41 = vld [vmem:[#allocation5 + $0xa0] ss:$24 sps:$4 sm:$0xff]   ;;  %v1136_v43 = vld [vmem:[%s1904_s5 + $0x5] ss:$0 sm:$0xff] }
 0x131   :  { %v220_v46 = vadd.f32 %v219_v45, %v100_v42  ;;  %v221_v47 = vpop.f32.mrb[2].mxu0  ;;  %v1127_v42 = vld [vmem:[%s1904_s5 + $0x4] ss:$0 sm:$0xff] }
 0x132   :  { %1471 = vtanh.f32 %v218_v44  ;;  %v222_v48 = vpop.f32.mrb[3].mxu0  ;;  %v226_v49 = vmul.f32 0.1, %v218_v44 }
 0x133   :  { %1473 = vtanh.f32 %v220_v46  ;;  %v227_v51 = vmul.f32 0.1, %v220_v46 }
 0x13c   :  { %v1472_v50 = vpop.eup %1471 }
 0x13d   :  { %v1474_v52 = vpop.eup %1473  ;;  %v228_v53 = vadd.f32 %v1472_v50, %v226_v49 }
 0x13e   :  { %v229_v54 = vadd.f32 %v1474_v52, %v227_v51 }
 0x13f   :  { %v246_v56 = vpack.c.bf16 %v228_v53, %v228_v53 }
 0x140   :  { %v361_v58 = vpack.c.bf16 %v229_v54, %v229_v54 }
 0x141   :  { %1252 = vmatmul.mubr.bf16.vlgmr.msra.gmra.mrb[0].mxu1 %v246_v56  ;;  %v73_v56 = vld [vmem:[%s1900_s1] sm:$0xff] }
 0x142   :  { %1272 = vmatmul.mubr.bf16.vlgmr.msra.gmra.mrb[4].mxu0 %v361_v58  ;;  %1276 = vmatpush3.bf16.msra.mxu1 %v1431_v55 }
 0x143   :  { %1296 = vmatpush3.bf16.msra.mxu0 %v1432_v57  ;;  %1277 = vmatprep.subr.bf16.mxu1 %v1659_v1 }
 0x144   :  { %1297 = vmatprep.subr.bf16.mxu0 %v1659_v1  ;;  %1291 = vmatprep.mubr.msk.bf16.mxu1 %vm1660_vm0, %v1659_v1 }
 0x145   :  { %1311 = vmatprep.mubr.msk.bf16.mxu0 %vm1660_vm0, %v1659_v1 }
 0x146   :  { %1278 = vmatpush3.bf16.msra.mxu1 %v1433_v59 }
 0x147   :  { %1298 = vmatpush3.bf16.msra.mxu0 %v1434_v60  ;;  %1279 = vmatprep.subr.bf16.mxu1 %v1659_v1 }
 0x148   :  { %1299 = vmatprep.subr.bf16.mxu0 %v1659_v1 }
 0x14a   :  { %1280 = vmatpush3.bf16.msra.mxu1 %v1435_v61 }
 0x14b   :  { %1300 = vmatpush3.bf16.msra.mxu0 %v1436_v62  ;;  %1281 = vmatprep.subr.bf16.mxu1 %v1659_v1  ;;  %v1459_v62 = vld [vmem:[#allocation5 + $0xd0] ss:$24 sps:$4 sm:$0xff]  }
 0x14c   :  { %1301 = vmatprep.subr.bf16.mxu0 %v1659_v1 }
 0x14e   :  { %1282 = vmatpush3.bf16.msra.mxu1 %v1437_v63  ;;  %v1460_v63 = vld [vmem:[#allocation5 + $0x100] ss:$24 sps:$4 sm:$0xff]  }
 0x14f   :  { %1283 = vmatprep.subr.bf16.mxu1 %v1659_v1  ;;  %1302 = vmatpush3.bf16.msra.mxu0 %v1438_v0  ;;  %v1461_v0 = vld [vmem:[#allocation5 + $0x130] ss:$24 sps:$4 sm:$0xff]  }
 0x150   :  { %1303 = vmatprep.subr.bf16.mxu0 %v1659_v1 }
 0x152   :  { %1284 = vmatpush3.bf16.msra.mxu1 %v1439_v2  ;;  %v1462_v2 = vld [vmem:[#allocation5 + $0x160] ss:$24 sps:$4 sm:$0xff]  }
 0x153   :  { %1304 = vmatpush3.bf16.msra.mxu0 %v1440_v3  ;;  %1285 = vmatprep.subr.bf16.mxu1 %v1659_v1  ;;  %v1463_v3 = vld [vmem:[#allocation5 + $0x14] ss:$24 sps:$4 sm:$0xff]  }
 0x154   :  { %1305 = vmatprep.subr.bf16.mxu0 %v1659_v1 }
 0x156   :  { %1286 = vmatpush3.bf16.msra.mxu1 %v1441_v4  ;;  %v1464_v4 = vld [vmem:[#allocation5 + $0x44] ss:$24 sps:$4 sm:$0xff]  }
 0x157   :  { %1306 = vmatpush3.bf16.msra.mxu0 %v1442_v5  ;;  %1287 = vmatprep.subr.bf16.mxu1 %v1659_v1  ;;  %v1465_v5 = vld [vmem:[#allocation5 + $0x74] ss:$24 sps:$4 sm:$0xff]  }
 0x158   :  { %1307 = vmatprep.subr.bf16.mxu0 %v1659_v1 }
 0x15a   :  { %1288 = vmatpush3.bf16.msra.mxu1 %v1443_v6  ;;  %v1466_v6 = vld [vmem:[#allocation5 + $0xa4] ss:$24 sps:$4 sm:$0xff]  }
 0x15b   :  { %1308 = vmatpush3.bf16.msra.mxu0 %v1444_v7  ;;  %1289 = vmatprep.subr.bf16.mxu1 %v1659_v1  ;;  %v1145_v7 = vld [vmem:[%s1904_s5 + $0x6] ss:$0 sm:$0xff] }
 0x15c   :  { %1309 = vmatprep.subr.bf16.mxu0 %v1659_v1 }
 0x15e   :  { %1290 = vmatpush3.bf16.msra.mxu1 %v1445_v8 }
 0x15f   :  { %1310 = vmatpush3.bf16.msra.mxu0 %v1446_v9  ;;  %1315 = vmatprep.subr.bf16.mxu1 %v1659_v1 }
 0x160   :  { %1335 = vmatprep.subr.bf16.mxu0 %v1659_v1 }
 0x214   :  { %v336_v12 = vpop.f32.mrb[0].mxu1 }
 0x215   :  { %v337_v13 = vadd.f32 %v1109_v10, %v336_v12  ;;  %v1253_v14 = vpop.f32.mrb[1].mxu1  ;;  %v451_v15 = vpop.f32.mrb[4].mxu0 }
 0x216   :  { %v452_v16 = vadd.f32 %v1118_v11, %v451_v15  ;;  %v339_v17 = vpop.f32.mrb[2].mxu1  ;;  %v1273_v18 = vpop.f32.mrb[5].mxu0 }
 0x217   :  { %1475 = vtanh.f32 %v337_v13  ;;  %v1254_v19 = vpop.f32.mrb[3].mxu1  ;;  %v454_v20 = vpop.f32.mrb[6].mxu0  ;;  %v343_v22 = vmul.f32 0.1, %v337_v13  ;;  %v1467_v17 = vld [vmem:[#allocation5 + $0xd4] ss:$24 sps:$4 sm:$0xff]  }
 0x218   :  { %1477 = vtanh.f32 %v452_v16  ;;  %v1274_v21 = vpop.f32.mrb[7].mxu0  ;;  %v458_v24 = vmul.f32 0.1, %v452_v16  ;;  %v1468_v18 = vld [vmem:[#allocation5 + $0x104] ss:$24 sps:$4 sm:$0xff]  }
 0x219   :  { %v1469_v19 = vld [vmem:[#allocation5 + $0x134] ss:$24 sps:$4 sm:$0xff]   ;;  %v1470_v20 = vld [vmem:[#allocation5 + $0x164] ss:$24 sps:$4 sm:$0xff]  }
 0x21a   :  { %v1154_v21 = vld [vmem:[%s1904_s5 + $0x7] ss:$0 sm:$0xff] }
 0x221   :  { %v1476_v23 = vpop.eup %1475 }
 0x222   :  { %v1478_v25 = vpop.eup %1477  ;;  %v344_v26 = vadd.f32 %v1476_v23, %v343_v22 }
 0x223   :  { %v459_v27 = vadd.f32 %v1478_v25, %v458_v24 }
 0x224   :  { %v476_v29 = vpack.c.bf16 %v344_v26, %v344_v26 }
 0x225   :  { %v588_v30 = vpack.c.bf16 %v459_v27, %v459_v27 }
 0x226   :  { %1292 = vmatmul.mubr.bf16.vlgmr.msra.gmra.mrb[4].mxu1 %v476_v29 }
 0x227   :  { %1312 = vmatmul.mubr.bf16.vlgmr.msra.gmra.mrb[8].mxu0 %v588_v30  ;;  %1316 = vmatpush3.bf16.msra.mxu1 %v1447_v28 }
 0x228   :  { %1317 = vmatprep.subr.bf16.mxu1 %v1659_v1  ;;  %1331 = vmatprep.mubr.msk.bf16.mxu1 %vm1660_vm0, %v1659_v1 }
 0x229   :  { %1351 = vmatprep.mubr.msk.bf16.mxu0 %vm1660_vm0, %v1659_v1  ;;  %1336 = vmatpush3.bf16.msra.mxu0 %v1455_v38 }
 0x22a   :  { %1337 = vmatprep.subr.bf16.mxu0 %v1659_v1 }
 0x22b   :  { %1318 = vmatpush3.bf16.msra.mxu1 %v1448_v31 }
 0x22c   :  { %1319 = vmatprep.subr.bf16.mxu1 %v1659_v1 }
 0x22d   :  { %1338 = vmatpush3.bf16.msra.mxu0 %v1456_v39 }
 0x22e   :  { %1339 = vmatprep.subr.bf16.mxu0 %v1659_v1 }
 0x22f   :  { %1320 = vmatpush3.bf16.msra.mxu1 %v1449_v32 }
 0x230   :  { %1321 = vmatprep.subr.bf16.mxu1 %v1659_v1 }
 0x231   :  { %1340 = vmatpush3.bf16.msra.mxu0 %v1457_v40 }
 0x232   :  { %1341 = vmatprep.subr.bf16.mxu0 %v1659_v1 }
 0x233   :  { %1322 = vmatpush3.bf16.msra.mxu1 %v1450_v33 }
 0x234   :  { %1323 = vmatprep.subr.bf16.mxu1 %v1659_v1 }
 0x235   :  { %1342 = vmatpush3.bf16.msra.mxu0 %v1458_v41 }
 0x236   :  { %1343 = vmatprep.subr.bf16.mxu0 %v1659_v1 }
 0x237   :  { %1324 = vmatpush3.bf16.msra.mxu1 %v1451_v34 }
 0x238   :  { %1325 = vmatprep.subr.bf16.mxu1 %v1659_v1 }
 0x239   :  { %1344 = vmatpush3.bf16.msra.mxu0 %v1459_v62 }
 0x23a   :  { %1345 = vmatprep.subr.bf16.mxu0 %v1659_v1 }
 0x23b   :  { %1326 = vmatpush3.bf16.msra.mxu1 %v1452_v35 }
 0x23c   :  { %1327 = vmatprep.subr.bf16.mxu1 %v1659_v1 }
 0x23d   :  { %1346 = vmatpush3.bf16.msra.mxu0 %v1460_v63 }
 0x23e   :  { %1347 = vmatprep.subr.bf16.mxu0 %v1659_v1 }
 0x23f   :  { %1328 = vmatpush3.bf16.msra.mxu1 %v1453_v36 }
 0x240   :  { %1329 = vmatprep.subr.bf16.mxu1 %v1659_v1 }
 0x241   :  { %1348 = vmatpush3.bf16.msra.mxu0 %v1461_v0 }
 0x242   :  { %1349 = vmatprep.subr.bf16.mxu0 %v1659_v1 }
 0x243   :  { %1330 = vmatpush3.bf16.msra.mxu1 %v1454_v37 }
 0x244   :  { %1355 = vmatprep.subr.bf16.mxu1 %v1659_v1 }
 0x245   :  { %1350 = vmatpush3.bf16.msra.mxu0 %v1462_v2 }
 0x2f9   :  { %v566_v44 = vpop.f32.mrb[4].mxu1 }
 0x2fa   :  { %v567_v45 = vadd.f32 %v1127_v42, %v566_v44  ;;  %v1293_v46 = vpop.f32.mrb[5].mxu1  ;;  %v678_v47 = vpop.f32.mrb[8].mxu0 }
 0x2fb   :  { %v679_v48 = vadd.f32 %v1136_v43, %v678_v47  ;;  %v569_v49 = vpop.f32.mrb[6].mxu1  ;;  %v1313_v50 = vpop.f32.mrb[9].mxu0 }
 0x2fc   :  { %1033 = vst [vmem:[#allocation9] sm:$0xff] %v567_v45  ;;  %v1294_v51 = vpop.f32.mrb[7].mxu1  ;;  %v681_v52 = vpop.f32.mrb[10].mxu0 }
 0x2fd   :  { %v684_v53 = vmul.f32 0.5, %v679_v48  ;;  %v1314_v54 = vpop.f32.mrb[11].mxu0 }
 0x2ff   :  { %v685_v55 = vmul.f32 1.442695, %v684_v53 }
 0x301   :  { %1479 = vpow2.f32 %v685_v55 }
 0x30b   :  { %v1480_v57 = vpop.eup %1479 }
 0x30c   :  { %v688_v58 = vmul.f32 %v1480_v57, %v73_v56  ;;  %v687_v59 = vmul.f32 %v1480_v57, %v1480_v57 }
 0x30e   :  { %v689_v60 = vadd.f32 %v688_v58, %v567_v45  ;;  %1034 = vst [vmem:[#allocation11] sm:$0xff] %v687_v59 }
 0x310   :  { %v706_v61 = vpack.c.bf16 %v689_v60, %v689_v60  ;;  %1035 = vst [vmem:[#allocation12] sm:$0xff] %v689_v60 }
 0x312   :  { %1332 = vmatmul.mubr.bf16.vlgmr.msra.gmra.mrb[8].mxu1 %v706_v61 }
 0x313   :  { %1371 = vmatprep.mubr.msk.bf16.mxu1 %vm1660_vm0, %v1659_v1  ;;  %1356 = vmatpush3.bf16.msra.mxu1 %v1463_v3 }
 0x314   :  { %1357 = vmatprep.subr.bf16.mxu1 %v1659_v1 }
 0x317   :  { %1358 = vmatpush3.bf16.msra.mxu1 %v1464_v4 }
 0x318   :  { %1359 = vmatprep.subr.bf16.mxu1 %v1659_v1 }
 0x31b   :  { %1360 = vmatpush3.bf16.msra.mxu1 %v1465_v5 }
 0x31c   :  { %1361 = vmatprep.subr.bf16.mxu1 %v1659_v1 }
 0x31f   :  { %1362 = vmatpush3.bf16.msra.mxu1 %v1466_v6 }
 0x320   :  { %1363 = vmatprep.subr.bf16.mxu1 %v1659_v1 }
 0x323   :  { %1364 = vmatpush3.bf16.msra.mxu1 %v1467_v17 }
 0x324   :  { %1365 = vmatprep.subr.bf16.mxu1 %v1659_v1 }
 0x327   :  { %1366 = vmatpush3.bf16.msra.mxu1 %v1468_v18 }
 0x328   :  { %1367 = vmatprep.subr.bf16.mxu1 %v1659_v1 }
 0x32b   :  { %1368 = vmatpush3.bf16.msra.mxu1 %v1469_v19 }
 0x32c   :  { %1369 = vmatprep.subr.bf16.mxu1 %v1659_v1 }
 0x32f   :  { %1370 = vmatpush3.bf16.msra.mxu1 %v1470_v20 }
 0x3e5   :  { %v796_v8 = vpop.f32.mrb[8].mxu1 }
 0x3e6   :  { %v797_v9 = vadd.f32 %v1145_v7, %v796_v8  ;;  %v1333_v10 = vpop.f32.mrb[9].mxu1 }
 0x3e7   :  { %v799_v11 = vpop.f32.mrb[10].mxu1 }
 0x3e8   :  { %1481 = vtanh.f32 %v797_v9  ;;  %v1334_v12 = vpop.f32.mrb[11].mxu1  ;;  %v803_v13 = vmul.f32 0.1, %v797_v9 }
 0x3f2   :  { %v1482_v14 = vpop.eup %1481 }
 0x3f3   :  { %v804_v15 = vadd.f32 %v1482_v14, %v803_v13 }
 0x3f5   :  { %v821_v16 = vpack.c.bf16 %v804_v15, %v804_v15 }
 0x3f7   :  { %1352 = vmatmul.mubr.bf16.vlgmr.msra.gmra.mrb[12].mxu0 %v821_v16 }
 0x4ca   :  { %v911_v22 = vpop.f32.mrb[12].mxu0 }
 0x4cb   :  { %v912_v23 = vadd.f32 %v1154_v21, %v911_v22  ;;  %v1353_v24 = vpop.f32.mrb[13].mxu0 }
 0x4cc   :  { %v914_v25 = vpop.f32.mrb[14].mxu0 }
 0x4cd   :  { %1483 = vtanh.f32 %v912_v23  ;;  %v1354_v26 = vpop.f32.mrb[15].mxu0  ;;  %v918_v27 = vmul.f32 0.1, %v912_v23 }
 0x4d7   :  { %v1484_v28 = vpop.eup %1483 }
 0x4d8   :  { %v919_v29 = vadd.f32 %v1484_v28, %v918_v27 }
 0x4da   :  { %v936_v30 = vpack.c.bf16 %v919_v29, %v919_v29 }
 0x4dc   :  { %1372 = vmatmul.mubr.bf16.vlgmr.msra.gmra.mrb[12].mxu1 %v936_v30 }
 0x4dd   :  { %1562 = shalt.err (!%p1559_p0)
}
 0x4de   :  { %s1563_s24 = scalar_lea.hbm %s1906_s7, 128 }
 0x4df   :  { %p1564_p1 = scmp.ne.s32.totalorder %s1906_s7, %s1563_s24  ;;  %p1567_p2 = scmp.lt.u32.totalorder %s1563_s24, %s1906_s7 }
 0x4e1   :  { %p1569_p3 = pnand %p1567_p2, %p1564_p1 }
 0x4e3   :  { %1572 = shalt.err (!%p1569_p3)
}
 0x4e4   :  { %1055 = dma.vmem_to_hbm [thread:$0]  %s1053_s22, 128, %s1906_s7, [#allocation10]  }
 0x4e5   :  { %s1662_s30 = smov [#allocation11]   ;;  %s1663_s12 = smov [#allocation12]  }
 0x4e6   :  { %s1062_s11 = sshll.u32 %s1662_s30, 4  ;;  %s1072_s3 = sshll.u32 %s1663_s12, 4  ;;  %s1063_s11 = int_to_ptr.vmem [resolvable:$true] %s1062_s11  ;;  %s1073_s3 = int_to_ptr.vmem [resolvable:$true] %s1072_s3 }
 0x4e7   :  { %s1573_s10 = scalar_lea.vmem %s1063_s11, 128  ;;  %p1578_p5 = scmp.lt.s32.totalorder %s1063_s11, %s1063_s11 }
 0x4e8   :  { %p1574_p4 = scmp.ne.s32.totalorder %s1063_s11, %s1573_s10  ;;  %p1579_p6 = scmp.lt.s32.totalorder %s1573_s10, %s1573_s10 }
 0x4ea   :  { %p1580_p7 = por %p1579_p6, %p1578_p5 }
 0x4ec   :  { %p1581_p8 = pnand %p1580_p7, %p1574_p4 }
 0x4ee   :  { %1584 = shalt.err (!%p1581_p8)
}
 0x4ef   :  { %s1585_s15 = scalar_lea.hbm %s1907_s8, 128 }
 0x4f0   :  { %p1586_p9 = scmp.ne.s32.totalorder %s1907_s8, %s1585_s15  ;;  %p1589_p10 = scmp.lt.u32.totalorder %s1585_s15, %s1907_s8 }
 0x4f2   :  { %p1591_p11 = pnand %p1589_p10, %p1586_p9 }
 0x4f4   :  { %1594 = shalt.err (!%p1591_p11)
}
 0x4f5   :  { %1065 = dma.vmem_to_hbm [thread:$0]  %s1063_s11, 128, %s1907_s8, [#allocation10]  }
 0x4f6   :  { %s1595_s20 = scalar_lea.vmem %s1073_s3, 128  ;;  %p1600_p13 = scmp.lt.s32.totalorder %s1073_s3, %s1073_s3 }
 0x4f7   :  { %p1596_p12 = scmp.ne.s32.totalorder %s1073_s3, %s1595_s20  ;;  %p1601_p0 = scmp.lt.s32.totalorder %s1595_s20, %s1595_s20 }
 0x4f9   :  { %p1602_p1 = por %p1601_p0, %p1600_p13 }
 0x4fb   :  { %p1603_p2 = pnand %p1602_p1, %p1596_p12 }
 0x4fd   :  { %1606 = shalt.err (!%p1603_p2)
}
 0x4fe   :  { %s1607_s23 = scalar_lea.hbm %s1908_s9, 128 }
 0x4ff   :  { %p1608_p3 = scmp.ne.s32.totalorder %s1908_s9, %s1607_s23  ;;  %p1611_p4 = scmp.lt.u32.totalorder %s1607_s23, %s1908_s9 }
 0x501   :  { %p1613_p5 = pnand %p1611_p4, %p1608_p3 }
 0x503   :  { %1616 = shalt.err (!%p1613_p5)
}
 0x504   :  { %1075 = dma.vmem_to_hbm [thread:$0]  %s1073_s3, 128, %s1908_s9, [#allocation13]   ;;  %v1163_v1 = vld [vmem:[%s1904_s5 + $0x8] ss:$0 sm:$0xff] }
 0x505   :  { %s1664_s0 = smov [#allocation8]  }
 0x506   :  { %s1042_s29 = sshll.u32 %s1664_s0, 4  ;;  %s1043_s29 = int_to_ptr.vmem [resolvable:$true] %s1042_s29 }
 0x507   :  { %s1617_s30 = scalar_lea.vmem %s1043_s29, 128  ;;  %p1622_p7 = scmp.lt.s32.totalorder %s1043_s29, %s1043_s29 }
 0x508   :  { %p1618_p6 = scmp.ne.s32.totalorder %s1043_s29, %s1617_s30  ;;  %p1623_p8 = scmp.lt.s32.totalorder %s1617_s30, %s1617_s30 }
 0x50a   :  { %p1624_p9 = por %p1623_p8, %p1622_p7 }
 0x50c   :  { %p1625_p10 = pnand %p1624_p9, %p1618_p6 }
 0x5af   :  { %v1026_v31 = vpop.f32.mrb[12].mxu1 }
 0x5b0   :  { %v1027_v32 = vadd.f32 %v1163_v1, %v1026_v31  ;;  %v1373_v33 = vpop.f32.mrb[13].mxu1 }
 0x5b1   :  { %v1029_v34 = vpop.f32.mrb[14].mxu1 }
 0x5b2   :  { %1032 = vst [vmem:[#allocation8] sm:$0xff] %v1027_v32  ;;  %v1374_v35 = vpop.f32.mrb[15].mxu1 }
 0x5b3   :  { %1628 = shalt.err (!%p1625_p10)
}
 0x5b4   :  { %s1629_s5 = scalar_lea.hbm %s1905_s6, 128 }
 0x5b5   :  { %p1630_p11 = scmp.ne.s32.totalorder %s1905_s6, %s1629_s5  ;;  %p1633_p12 = scmp.lt.u32.totalorder %s1629_s5, %s1905_s6 }
 0x5b7   :  { %p1635_p13 = pnand %p1633_p12, %p1630_p11 }
 0x5b9   :  { %1638 = shalt.err (!%p1635_p13)
}
 0x5ba   :  { %1045 = dma.vmem_to_hbm [thread:$0]  %s1043_s29, 128, %s1905_s6, [#allocation4]  }
 0x5bb   :  { %1643 = dma.done.wait [#allocation4], 128  }
 0x5bc   :  { %1644 = vsyncadd [#allocation4], 4294967168 }
 0x5bd   :  { %1645 = dma.done.wait [#allocation10], 256  }
 0x5be   :  { %1646 = vsyncadd [#allocation10], 4294967040 }
 0x5bf   :  { %1647 = dma.done.wait [#allocation13], 128  }
 0x5c0   :  { %1648 = vsyncadd [#allocation13], 4294967168 }
 0x5c1   :  { %1088 = vsyncpa [#allocation3], 1 }
 0x5c2   :  { %1089 = vsyncpa [#allocation6], 1 }
 0x5c3   :  { %1090 = vsyncpa [#allocation4], 1 }
 0x5c4   :  { %1091 = vsyncpa [#allocation10], 1 }
 0x5c5   :  { %1092 = vsyncpa [#allocation13], 1 }

</bundles_post_ra>
